<compile_context>
chip_gen: v6e
topology: v6e:2x2x1
jax: 0.10.0
libtpu: 0.0.40
codegen_flags: <defaults>
</compile_context>

<pallas_src>
import math

import jax
import jax.numpy as jnp
from jax.experimental import pallas as pl
from jax.experimental.pallas import tpu as pltpu


def _bvlstm_kernel(x_ref, hp_ref, wx_ref, wh_ref, u_ref, b_ref,
                   y_ref, yt_ref, proj_ref):
    """Fused bidirectional BVLSTM recurrence (both directions in one body).

    x_ref   : (L, B, Dx)   time-major inputs
    hp_ref  : (L, B, 2H)   time-major h_prev, [..., :H]=fwd slice, [..., H:]=bwd slice
    wx_ref  : (Dx, 8H)     columns (each H wide): [i_f,i_b,f_f,f_b,g_f,g_b,o_f,o_b]
    wh_ref  : (2H, 8H)     rows :H act on hp_fwd, rows H: act on hp_bwd (block structure)
    u_ref   : (2H, 8H)     block-diagonal recurrent weights (u_i / u_i_b tiled per gate)
    b_ref   : (1, 8H)      biases (b_i / b_i_b per column block)
    y_ref   : (L, B, 2H)   hidden states; [..., :H]=fwd(t), [..., H:]=bwd already time-flipped
    yt_ref  : (B, 2H)      final hidden state [h_fwd | h_bwd]
    proj_ref: (L*B, 8H)    VMEM scratch: hoisted non-recurrent projection, row = (t, b)
    """
    L, B, Dx = x_ref.shape
    H2 = hp_ref.shape[2]
    H = H2 // 2
    G8 = 8 * H

    # ---- Hoisted non-recurrent projection: two big MXU passes over the whole
    #      sequence, off the serial recurrence critical path. ----
    x2 = x_ref[...].reshape(L * B, Dx)
    hp2 = hp_ref[...].reshape(L * B, H2)
    proj_ref[...] = (
        jnp.dot(x2, wx_ref[...], preferred_element_type=jnp.float32)
        + jnp.dot(hp2, wh_ref[...], preferred_element_type=jnp.float32)
        + b_ref[...]
    )

    u = u_ref[...]  # hoisted load of recurrent weight slab

    # Lane mask selecting forward-direction columns (even H-wide column blocks).
    lane = jax.lax.broadcasted_iota(jnp.int32, (1, G8), 1)
    fwd_cols = (lane % (2 * H)) < H

    h = jnp.zeros((B, H2), jnp.float32)   # [h_fwd | h_bwd]
    c = jnp.zeros((B, H2), jnp.float32)   # [c_fwd | c_bwd]

    # Static unroll (L is small): every index below is a compile-time constant.
    for t in range(L):
        # One 256-lane MXU push covers the recurrent term of BOTH directions.
        rec = jnp.dot(h, u, preferred_element_type=jnp.float32)          # (B, 8H)
        p_t = proj_ref[pl.ds(t * B, B), :]                               # fwd uses time t
        p_r = proj_ref[pl.ds((L - 1 - t) * B, B), :]                     # bwd uses time L-1-t
        pre = jnp.where(fwd_cols, p_t, p_r) + rec
        gates = jax.nn.sigmoid(pre)                                      # single EUP pass, (B, 8H)
        i_g = gates[:, 0 * H2:1 * H2]      # [i_f | i_b]
        f_g = gates[:, 1 * H2:2 * H2]      # [f_f | f_b]
        g_g = gates[:, 2 * H2:3 * H2]      # [g_f | g_b]  (sic: sigmoid, per source)
        o_g = gates[:, 3 * H2:4 * H2]      # [o_f | o_b]
        c = f_g + c + i_g * g_g            # (sic) additive cell update, both dirs at once
        h = o_g + jnp.tanh(c)              # (sic) additive hidden update
        y_ref[t, :, 0:H] = h[:, 0:H]                  # forward hidden at time t
        y_ref[L - 1 - t, :, H:H2] = h[:, H:H2]        # backward hidden, pre-flipped to time order

    yt_ref[...] = h                        # final [h_fwd | h_bwd] — no epilogue concat needed


def prepare_bvlstm_params(params):
    """One-time, parameter-only fusion of the 16 weight matrices / 2 biases used by
    the forward pass into MXU-friendly slabs.  Column blocks (each H wide) are
    ordered [i_f, i_b, f_f, f_b, g_f, g_b, o_f, o_b]."""
    H = params["u_i"].shape[0]
    Dh = params["w_i_h"].shape[0]
    assert Dh == H, "BVLSTM.forward requires input_size_h == hidden_size"
    zero_h = jnp.zeros((H, H), jnp.float32)
    u_f_col = jnp.concatenate([params["u_i"], zero_h], axis=0)       # (2H, H)
    u_b_col = jnp.concatenate([zero_h, params["u_i_b"]], axis=0)     # (2H, H)

    wx_cols, wh_cols, u_cols, b_cols = [], [], [], []
    for g in ("i", "f", "c", "o"):
        wx_cols += [params[f"w_{g}_x"], params[f"w_{g}_x_b"]]
        wh_cols += [jnp.concatenate([params[f"w_{g}_h"], zero_h], axis=0),
                    jnp.concatenate([zero_h, params[f"w_{g}_h_b"]], axis=0)]
        u_cols += [u_f_col, u_b_col]                                  # all gates use u_i / u_i_b (sic)
        b_cols += [params["b_i"], params["b_i_b"]]                    # all gates use b_i / b_i_b (sic)

    wx = jnp.concatenate(wx_cols, axis=1).astype(jnp.float32)         # (Dx, 8H)
    wh = jnp.concatenate(wh_cols, axis=1).astype(jnp.float32)         # (2H, 8H)
    u = jnp.concatenate(u_cols, axis=1).astype(jnp.float32)           # (2H, 8H)
    b = jnp.concatenate(b_cols, axis=0).reshape(1, 8 * H).astype(jnp.float32)  # (1, 8H)
    return wx, wh, u, b


def bvlstm_forward(x, h_prev, fused):
    """x: (B, L, Dx), h_prev: (B, L, 2H); fused = prepare_bvlstm_params(params)."""
    wx, wh, u, b = fused
    B, L, _ = x.shape
    H2 = h_prev.shape[2]
    H = H2 // 2

    # Only per-call layout ops: two swapaxes to time-major (no flips / concats / tiles).
    x_tm = jnp.swapaxes(x, 0, 1).astype(jnp.float32)        # (L, B, Dx)
    hp_tm = jnp.swapaxes(h_prev, 0, 1).astype(jnp.float32)  # (L, B, 2H)

    y, y_t = pl.pallas_call(
        _bvlstm_kernel,
        out_shape=(jax.ShapeDtypeStruct((L, B, H2), jnp.float32),
                   jax.ShapeDtypeStruct((B, H2), jnp.float32)),
        in_specs=[pl.BlockSpec(memory_space=pltpu.MemorySpace.VMEM)] * 6,
        out_specs=(pl.BlockSpec(memory_space=pltpu.MemorySpace.VMEM),
                   pl.BlockSpec(memory_space=pltpu.MemorySpace.VMEM)),
        scratch_shapes=[pltpu.VMEM((L * B, 4 * H2), jnp.float32)],
    )(x_tm, hp_tm, wx, wh, u, b)

    y_net = jnp.swapaxes(y, 0, 1)   # (B, L, 2H) — only epilogue op
    return y_t, y_net


def bvlstm_ref(x, h_prev, p):
    """Pure-JAX reference mirroring the PyTorch forward exactly."""
    B, L, Dx = x.shape
    H = p["u_i"].shape[0]
    hpf = h_prev[:, :, 0:H]
    hpb = h_prev[:, :, H:2 * H]
    hi = jax.lax.Precision.HIGHEST
    mm = lambda a, b: jnp.dot(a, b, precision=hi)
    h = jnp.zeros((B, H), jnp.float32)
    c = jnp.zeros((B, H), jnp.float32)
    hb = jnp.zeros((B, H), jnp.float32)
    cb = jnp.zeros((B, H), jnp.float32)
    seq, seq_b = [], []
    for t in range(L):
        x_t, hp = x[:, t], hpf[:, t]
        i_t = jax.nn.sigmoid(mm(x_t, p["w_i_x"]) + mm(hp, p["w_i_h"]) + mm(h, p["u_i"]) + p["b_i"])
        f_t = jax.nn.sigmoid(mm(x_t, p["w_f_x"]) + mm(hp, p["w_f_h"]) + mm(h, p["u_i"]) + p["b_i"])
        g_t = jax.nn.sigmoid(mm(x_t, p["w_c_x"]) + mm(hp, p["w_c_h"]) + mm(h, p["u_i"]) + p["b_i"])
        o_t = jax.nn.sigmoid(mm(x_t, p["w_o_x"]) + mm(hp, p["w_o_h"]) + mm(h, p["u_i"]) + p["b_i"])
        c = f_t + c + i_t * g_t
        h = o_t + jnp.tanh(c)
        x_tb, hpb_t = x[:, L - t - 1], hpb[:, L - t - 1]
        i_b = jax.nn.sigmoid(mm(x_tb, p["w_i_x_b"]) + mm(hpb_t, p["w_i_h_b"]) + mm(hb, p["u_i_b"]) + p["b_i_b"])
        f_b = jax.nn.sigmoid(mm(x_tb, p["w_f_x_b"]) + mm(hpb_t, p["w_f_h_b"]) + mm(hb, p["u_i_b"]) + p["b_i_b"])
        g_b = jax.nn.sigmoid(mm(x_tb, p["w_c_x_b"]) + mm(hpb_t, p["w_c_h_b"]) + mm(hb, p["u_i_b"]) + p["b_i_b"])
        o_b = jax.nn.sigmoid(mm(x_tb, p["w_o_x_b"]) + mm(hpb_t, p["w_o_h_b"]) + mm(hb, p["u_i_b"]) + p["b_i_b"])
        cb = f_b + cb + i_b * g_b
        hb = o_b + jnp.tanh(cb)
        seq.append(h)
        seq_b.append(hb)
    hidden_seq = jnp.stack(seq, axis=1)
    hidden_seq_b = jnp.flip(jnp.stack(seq_b, axis=1), axis=1)
    y_net = jnp.concatenate([hidden_seq, hidden_seq_b], axis=2)
    y_t = jnp.concatenate([h, hb], axis=1)
    return y_t, y_net


def init_params(key, input_size_x, input_size_h, hidden_size):
    stdv = 1.0 / math.sqrt(hidden_size)
    shapes = {}
    for g in ("i", "f", "c", "o"):
        for suf in ("", "_b"):
            shapes[f"w_{g}_x{suf}"] = (input_size_x, hidden_size)
            shapes[f"w_{g}_h{suf}"] = (input_size_h, hidden_size)
            shapes[f"u_{g}{suf}"] = (hidden_size, hidden_size)
            shapes[f"b_{g}{suf}"] = (hidden_size,)
    keys = jax.random.split(key, len(shapes))
    params = {}
    for k, (name, shape) in zip(keys, shapes.items()):
        params[name] = jax.random.uniform(k, shape, jnp.float32, -stdv, stdv)
    return params


if __name__ == "__main__":
    B, L, Dx, H = 2, 8, 16, 32
    Dh = H  # h_prev slices are (B, H) and multiply (input_size_h, H) weights

    key = jax.random.PRNGKey(0)
    kp, kx, kh = jax.random.split(key, 3)
    params = init_params(kp, Dx, Dh, H)
    x = jax.random.normal(kx, (B, L, Dx), jnp.float32)
    h_prev = jax.random.normal(kh, (B, L, 2 * H), jnp.float32)

    # Parameter-only slab fusion: done once, outside the per-call path.
    fused = prepare_bvlstm_params(params)

    y_t, y_net = jax.jit(bvlstm_forward)(x, h_prev, fused)
    y_t = jax.block_until_ready(y_t)
    y_net = jax.block_until_ready(y_net)

    yr_t, yr_net = bvlstm_ref(x, h_prev, params)
    assert y_t.shape == (B, 2 * H) and y_net.shape == (B, L, 2 * H)
    # Reference uses Precision.HIGHEST; kernel uses default MXU precision -> small slack.
    assert jnp.allclose(y_t, yr_t, atol=5e-4, rtol=5e-4)
    assert jnp.allclose(y_net, yr_net, atol=5e-4, rtol=5e-4)

    print("KERNEL_OK")
</pallas_src>

<mosaic_0001>
module attributes {stable_mosaic.version = 11 : i64} {
  func.func @_bvlstm_kernel(%arg0: memref<8x2x16xf32, #tpu.memory_space<vmem>>, %arg1: memref<8x2x64xf32, #tpu.memory_space<vmem>>, %arg2: memref<16x256xf32, #tpu.memory_space<vmem>>, %arg3: memref<64x256xf32, #tpu.memory_space<vmem>>, %arg4: memref<64x256xf32, #tpu.memory_space<vmem>>, %arg5: memref<1x256xf32, #tpu.memory_space<vmem>>, %arg6: memref<8x2x64xf32, #tpu.memory_space<vmem>>, %arg7: memref<2x64xf32, #tpu.memory_space<vmem>>, %arg8: memref<16x256xf32, #tpu.memory_space<vmem>>) attributes {dimension_semantics = [], scalar_prefetch = 0 : i64, scratch_operands = 1 : i64, tpu.core_type = #tpu.core_type<tc>} {
    %c0 = arith.constant 0 : index
    %c0_0 = arith.constant 0 : index
    %c0_1 = arith.constant 0 : index
    %0 = vector.load %arg0[%c0, %c0_0, %c0_1] : memref<8x2x16xf32, #tpu.memory_space<vmem>>, vector<8x2x16xf32>
    %1 = vector.shape_cast %0 : vector<8x2x16xf32> to vector<16x16xf32>
    %c0_2 = arith.constant 0 : index
    %c0_3 = arith.constant 0 : index
    %c0_4 = arith.constant 0 : index
    %2 = vector.load %arg1[%c0_2, %c0_3, %c0_4] : memref<8x2x64xf32, #tpu.memory_space<vmem>>, vector<8x2x64xf32>
    %3 = vector.shape_cast %2 : vector<8x2x64xf32> to vector<16x64xf32>
    %c0_5 = arith.constant 0 : index
    %c0_6 = arith.constant 0 : index
    %4 = vector.load %arg2[%c0_5, %c0_6] : memref<16x256xf32, #tpu.memory_space<vmem>>, vector<16x256xf32>
    %cst = arith.constant dense<0.000000e+00> : vector<16x256xf32>
    %5 = tpu.matmul %1, %4, %cst {dimension_numbers = #tpu.dot_dimension_numbers<[1], [0], [0], [1], [0, 0, 1, 1], [], []>} : vector<16x16xf32>, vector<16x256xf32>, vector<16x256xf32> -> vector<16x256xf32>
    %c0_7 = arith.constant 0 : index
    %c0_8 = arith.constant 0 : index
    %6 = vector.load %arg3[%c0_7, %c0_8] : memref<64x256xf32, #tpu.memory_space<vmem>>, vector<64x256xf32>
    %cst_9 = arith.constant dense<0.000000e+00> : vector<16x256xf32>
    %7 = tpu.matmul %3, %6, %cst_9 {dimension_numbers = #tpu.dot_dimension_numbers<[1], [0], [0], [1], [0, 0, 1, 1], [], []>} : vector<16x64xf32>, vector<64x256xf32>, vector<16x256xf32> -> vector<16x256xf32>
    %8 = arith.addf %5, %7 : vector<16x256xf32>
    %c0_10 = arith.constant 0 : index
    %c0_11 = arith.constant 0 : index
    %9 = vector.load %arg5[%c0_10, %c0_11] : memref<1x256xf32, #tpu.memory_space<vmem>>, vector<1x256xf32>
    %10 = vector.broadcast %9 : vector<1x256xf32> to vector<16x256xf32>
    %11 = arith.addf %8, %10 : vector<16x256xf32>
    %c0_12 = arith.constant 0 : index
    %c0_13 = arith.constant 0 : index
    %12 = vector.load %arg8[%c0_12, %c0_13] : memref<16x256xf32, #tpu.memory_space<vmem>>, vector<16x256xf32>
    tpu.vector_store %arg8[%c0_12, %c0_13], %11 {strides = array<i32>} : memref<16x256xf32, #tpu.memory_space<vmem>>, vector<16x256xf32>,
    %c0_14 = arith.constant 0 : index
    %c0_15 = arith.constant 0 : index
    %13 = vector.load %arg4[%c0_14, %c0_15] : memref<64x256xf32, #tpu.memory_space<vmem>>, vector<64x256xf32>
    %14 = tpu.iota {dimensions = array<i32: 1>} : vector<1x256xi32>
    %c64_i32 = arith.constant 64 : i32
    %c0_i32 = arith.constant 0 : i32
    %15 = arith.cmpi eq, %c64_i32, %c0_i32 : i32
    %c1_i32 = arith.constant 1 : i32
    %16 = arith.select %15, %c1_i32, %c64_i32 : i32
    %17 = vector.broadcast %16 : i32 to vector<1x256xi32>
    %18 = arith.remsi %14, %17 : vector<1x256xi32>
    %c0_i32_16 = arith.constant 0 : i32
    %19 = vector.broadcast %c0_i32_16 : i32 to vector<1x256xi32>
    %20 = arith.cmpi ne, %18, %19 : vector<1x256xi32>
    %c0_i32_17 = arith.constant 0 : i32
    %21 = vector.broadcast %c0_i32_17 : i32 to vector<1x256xi32>
    %22 = arith.cmpi slt, %18, %21 : vector<1x256xi32>
    %c0_i32_18 = arith.constant 0 : i32
    %23 = arith.cmpi slt, %16, %c0_i32_18 : i32
    %24 = vector.broadcast %23 : i1 to vector<1x256xi1>
    %25 = vector.broadcast %24 : vector<1x256xi1> to vector<1x256xi1>
    %26 = arith.xori %22, %25 : vector<1x256xi1>
    %27 = arith.andi %26, %20 : vector<1x256xi1>
    %28 = vector.broadcast %16 : i32 to vector<1x256xi32>
    %29 = arith.addi %18, %28 : vector<1x256xi32>
    %30 = arith.select %27, %29, %18 : vector<1x256xi1>, vector<1x256xi32>
    %c32_i32 = arith.constant 32 : i32
    %31 = vector.broadcast %c32_i32 : i32 to vector<1x256xi32>
    %32 = arith.cmpi slt, %30, %31 : vector<1x256xi32>
    %cst_19 = arith.constant 0.000000e+00 : f32
    %33 = vector.broadcast %cst_19 : f32 to vector<2x64xf32>
    %cst_20 = arith.constant 0.000000e+00 : f32
    %34 = vector.broadcast %cst_20 : f32 to vector<2x64xf32>
    %cst_21 = arith.constant dense<0.000000e+00> : vector<2x256xf32>
    %35 = tpu.matmul %33, %13, %cst_21 {dimension_numbers = #tpu.dot_dimension_numbers<[1], [0], [0], [1], [0, 0, 1, 1], [], []>} : vector<2x64xf32>, vector<64x256xf32>, vector<2x256xf32> -> vector<2x256xf32>
    %c0_22 = arith.constant 0 : index
    %c0_23 = arith.constant 0 : index
    %36 = vector.load %arg8[%c0_22, %c0_23] : memref<16x256xf32, #tpu.memory_space<vmem>>, vector<2x256xf32>
    %c14 = arith.constant 14 : index
    %c0_24 = arith.constant 0 : index
    %37 = vector.load %arg8[%c14, %c0_24] : memref<16x256xf32, #tpu.memory_space<vmem>>, vector<2x256xf32>
    %38 = vector.shape_cast %32 : vector<1x256xi1> to vector<1x256xi1>
    %39 = vector.broadcast %38 : vector<1x256xi1> to vector<2x256xi1>
    %40 = arith.select %39, %36, %37 : vector<2x256xi1>, vector<2x256xf32>
    %41 = arith.addf %40, %35 : vector<2x256xf32>
    %42 = arith.negf %41 : vector<2x256xf32>
    %43 = math.exp %42 : vector<2x256xf32>
    %cst_25 = arith.constant 1.000000e+00 : f32
    %44 = vector.broadcast %cst_25 : f32 to vector<2x256xf32>
    %45 = arith.addf %44, %43 : vector<2x256xf32>
    %46 = arith.divf %44, %45 : vector<2x256xf32>
    %47 = vector.extract_strided_slice %46 {offsets = [0, 0], sizes = [2, 64], strides = [1, 1]} : vector<2x256xf32> to vector<2x64xf32>
    %48 = vector.extract_strided_slice %46 {offsets = [0, 64], sizes = [2, 64], strides = [1, 1]} : vector<2x256xf32> to vector<2x64xf32>
    %49 = vector.extract_strided_slice %46 {offsets = [0, 128], sizes = [2, 64], strides = [1, 1]} : vector<2x256xf32> to vector<2x64xf32>
    %50 = vector.extract_strided_slice %46 {offsets = [0, 192], sizes = [2, 64], strides = [1, 1]} : vector<2x256xf32> to vector<2x64xf32>
    %51 = arith.addf %48, %34 : vector<2x64xf32>
    %52 = arith.mulf %47, %49 : vector<2x64xf32>
    %53 = arith.addf %51, %52 : vector<2x64xf32>
    %54 = math.tanh %53 : vector<2x64xf32>
    %55 = arith.addf %50, %54 : vector<2x64xf32>
    %56 = vector.extract_strided_slice %55 {offsets = [0, 0], sizes = [2, 32], strides = [1, 1]} : vector<2x64xf32> to vector<2x32xf32>
    %c0_26 = arith.constant 0 : index
    %c0_27 = arith.constant 0 : index
    %c0_28 = arith.constant 0 : index
    %57 = vector.load %arg6[%c0_26, %c0_27, %c0_28] : memref<8x2x64xf32, #tpu.memory_space<vmem>>, vector<1x2x32xf32>
    %58 = vector.shape_cast %57 : vector<1x2x32xf32> to vector<2x32xf32>
    %59 = vector.shape_cast %56 : vector<2x32xf32> to vector<1x2x32xf32>
    tpu.vector_store %arg6[%c0_26, %c0_27, %c0_28], %59 {strides = array<i32>} : memref<8x2x64xf32, #tpu.memory_space<vmem>>, vector<1x2x32xf32>,
    %60 = vector.extract_strided_slice %55 {offsets = [0, 32], sizes = [2, 32], strides = [1, 1]} : vector<2x64xf32> to vector<2x32xf32>
    %c7 = arith.constant 7 : index
    %c0_29 = arith.constant 0 : index
    %c32 = arith.constant 32 : index
    %61 = vector.load %arg6[%c7, %c0_29, %c32] : memref<8x2x64xf32, #tpu.memory_space<vmem>>, vector<1x2x32xf32>
    %62 = vector.shape_cast %61 : vector<1x2x32xf32> to vector<2x32xf32>
    %63 = vector.shape_cast %60 : vector<2x32xf32> to vector<1x2x32xf32>
    tpu.vector_store %arg6[%c7, %c0_29, %c32], %63 {strides = array<i32>} : memref<8x2x64xf32, #tpu.memory_space<vmem>>, vector<1x2x32xf32>,
    %cst_30 = arith.constant dense<0.000000e+00> : vector<2x256xf32>
    %64 = tpu.matmul %55, %13, %cst_30 {dimension_numbers = #tpu.dot_dimension_numbers<[1], [0], [0], [1], [0, 0, 1, 1], [], []>} : vector<2x64xf32>, vector<64x256xf32>, vector<2x256xf32> -> vector<2x256xf32>
    %c2 = arith.constant 2 : index
    %c0_31 = arith.constant 0 : index
    %65 = vector.load %arg8[%c2, %c0_31] : memref<16x256xf32, #tpu.memory_space<vmem>>, vector<2x256xf32>
    %c12 = arith.constant 12 : index
    %c0_32 = arith.constant 0 : index
    %66 = vector.load %arg8[%c12, %c0_32] : memref<16x256xf32, #tpu.memory_space<vmem>>, vector<2x256xf32>
    %67 = vector.shape_cast %32 : vector<1x256xi1> to vector<1x256xi1>
    %68 = vector.broadcast %67 : vector<1x256xi1> to vector<2x256xi1>
    %69 = arith.select %68, %65, %66 : vector<2x256xi1>, vector<2x256xf32>
    %70 = arith.addf %69, %64 : vector<2x256xf32>
    %71 = arith.negf %70 : vector<2x256xf32>
    %72 = math.exp %71 : vector<2x256xf32>
    %cst_33 = arith.constant 1.000000e+00 : f32
    %73 = vector.broadcast %cst_33 : f32 to vector<2x256xf32>
    %74 = arith.addf %73, %72 : vector<2x256xf32>
    %75 = arith.divf %73, %74 : vector<2x256xf32>
    %76 = vector.extract_strided_slice %75 {offsets = [0, 0], sizes = [2, 64], strides = [1, 1]} : vector<2x256xf32> to vector<2x64xf32>
    %77 = vector.extract_strided_slice %75 {offsets = [0, 64], sizes = [2, 64], strides = [1, 1]} : vector<2x256xf32> to vector<2x64xf32>
    %78 = vector.extract_strided_slice %75 {offsets = [0, 128], sizes = [2, 64], strides = [1, 1]} : vector<2x256xf32> to vector<2x64xf32>
    %79 = vector.extract_strided_slice %75 {offsets = [0, 192], sizes = [2, 64], strides = [1, 1]} : vector<2x256xf32> to vector<2x64xf32>
    %80 = arith.addf %77, %53 : vector<2x64xf32>
    %81 = arith.mulf %76, %78 : vector<2x64xf32>
    %82 = arith.addf %80, %81 : vector<2x64xf32>
    %83 = math.tanh %82 : vector<2x64xf32>
    %84 = arith.addf %79, %83 : vector<2x64xf32>
    %85 = vector.extract_strided_slice %84 {offsets = [0, 0], sizes = [2, 32], strides = [1, 1]} : vector<2x64xf32> to vector<2x32xf32>
    %c1 = arith.constant 1 : index
    %c0_34 = arith.constant 0 : index
    %c0_35 = arith.constant 0 : index
    %86 = vector.load %arg6[%c1, %c0_34, %c0_35] : memref<8x2x64xf32, #tpu.memory_space<vmem>>, vector<1x2x32xf32>
    %87 = vector.shape_cast %86 : vector<1x2x32xf32> to vector<2x32xf32>
    %88 = vector.shape_cast %85 : vector<2x32xf32> to vector<1x2x32xf32>
    tpu.vector_store %arg6[%c1, %c0_34, %c0_35], %88 {strides = array<i32>} : memref<8x2x64xf32, #tpu.memory_space<vmem>>, vector<1x2x32xf32>,
    %89 = vector.extract_strided_slice %84 {offsets = [0, 32], sizes = [2, 32], strides = [1, 1]} : vector<2x64xf32> to vector<2x32xf32>
    %c6 = arith.constant 6 : index
    %c0_36 = arith.constant 0 : index
    %c32_37 = arith.constant 32 : index
    %90 = vector.load %arg6[%c6, %c0_36, %c32_37] : memref<8x2x64xf32, #tpu.memory_space<vmem>>, vector<1x2x32xf32>
    %91 = vector.shape_cast %90 : vector<1x2x32xf32> to vector<2x32xf32>
    %92 = vector.shape_cast %89 : vector<2x32xf32> to vector<1x2x32xf32>
    tpu.vector_store %arg6[%c6, %c0_36, %c32_37], %92 {strides = array<i32>} : memref<8x2x64xf32, #tpu.memory_space<vmem>>, vector<1x2x32xf32>,
    %cst_38 = arith.constant dense<0.000000e+00> : vector<2x256xf32>
    %93 = tpu.matmul %84, %13, %cst_38 {dimension_numbers = #tpu.dot_dimension_numbers<[1], [0], [0], [1], [0, 0, 1, 1], [], []>} : vector<2x64xf32>, vector<64x256xf32>, vector<2x256xf32> -> vector<2x256xf32>
    %c4 = arith.constant 4 : index
    %c0_39 = arith.constant 0 : index
    %94 = vector.load %arg8[%c4, %c0_39] : memref<16x256xf32, #tpu.memory_space<vmem>>, vector<2x256xf32>
    %c10 = arith.constant 10 : index
    %c0_40 = arith.constant 0 : index
    %95 = vector.load %arg8[%c10, %c0_40] : memref<16x256xf32, #tpu.memory_space<vmem>>, vector<2x256xf32>
    %96 = vector.shape_cast %32 : vector<1x256xi1> to vector<1x256xi1>
    %97 = vector.broadcast %96 : vector<1x256xi1> to vector<2x256xi1>
    %98 = arith.select %97, %94, %95 : vector<2x256xi1>, vector<2x256xf32>
    %99 = arith.addf %98, %93 : vector<2x256xf32>
    %100 = arith.negf %99 : vector<2x256xf32>
    %101 = math.exp %100 : vector<2x256xf32>
    %cst_41 = arith.constant 1.000000e+00 : f32
    %102 = vector.broadcast %cst_41 : f32 to vector<2x256xf32>
    %103 = arith.addf %102, %101 : vector<2x256xf32>
    %104 = arith.divf %102, %103 : vector<2x256xf32>
    %105 = vector.extract_strided_slice %104 {offsets = [0, 0], sizes = [2, 64], strides = [1, 1]} : vector<2x256xf32> to vector<2x64xf32>
    %106 = vector.extract_strided_slice %104 {offsets = [0, 64], sizes = [2, 64], strides = [1, 1]} : vector<2x256xf32> to vector<2x64xf32>
    %107 = vector.extract_strided_slice %104 {offsets = [0, 128], sizes = [2, 64], strides = [1, 1]} : vector<2x256xf32> to vector<2x64xf32>
    %108 = vector.extract_strided_slice %104 {offsets = [0, 192], sizes = [2, 64], strides = [1, 1]} : vector<2x256xf32> to vector<2x64xf32>
    %109 = arith.addf %106, %82 : vector<2x64xf32>
    %110 = arith.mulf %105, %107 : vector<2x64xf32>
    %111 = arith.addf %109, %110 : vector<2x64xf32>
    %112 = math.tanh %111 : vector<2x64xf32>
    %113 = arith.addf %108, %112 : vector<2x64xf32>
    %114 = vector.extract_strided_slice %113 {offsets = [0, 0], sizes = [2, 32], strides = [1, 1]} : vector<2x64xf32> to vector<2x32xf32>
    %c2_42 = arith.constant 2 : index
    %c0_43 = arith.constant 0 : index
    %c0_44 = arith.constant 0 : index
    %115 = vector.load %arg6[%c2_42, %c0_43, %c0_44] : memref<8x2x64xf32, #tpu.memory_space<vmem>>, vector<1x2x32xf32>
    %116 = vector.shape_cast %115 : vector<1x2x32xf32> to vector<2x32xf32>
    %117 = vector.shape_cast %114 : vector<2x32xf32> to vector<1x2x32xf32>
    tpu.vector_store %arg6[%c2_42, %c0_43, %c0_44], %117 {strides = array<i32>} : memref<8x2x64xf32, #tpu.memory_space<vmem>>, vector<1x2x32xf32>,
    %118 = vector.extract_strided_slice %113 {offsets = [0, 32], sizes = [2, 32], strides = [1, 1]} : vector<2x64xf32> to vector<2x32xf32>
    %c5 = arith.constant 5 : index
    %c0_45 = arith.constant 0 : index
    %c32_46 = arith.constant 32 : index
    %119 = vector.load %arg6[%c5, %c0_45, %c32_46] : memref<8x2x64xf32, #tpu.memory_space<vmem>>, vector<1x2x32xf32>
    %120 = vector.shape_cast %119 : vector<1x2x32xf32> to vector<2x32xf32>
    %121 = vector.shape_cast %118 : vector<2x32xf32> to vector<1x2x32xf32>
    tpu.vector_store %arg6[%c5, %c0_45, %c32_46], %121 {strides = array<i32>} : memref<8x2x64xf32, #tpu.memory_space<vmem>>, vector<1x2x32xf32>,
    %cst_47 = arith.constant dense<0.000000e+00> : vector<2x256xf32>
    %122 = tpu.matmul %113, %13, %cst_47 {dimension_numbers = #tpu.dot_dimension_numbers<[1], [0], [0], [1], [0, 0, 1, 1], [], []>} : vector<2x64xf32>, vector<64x256xf32>, vector<2x256xf32> -> vector<2x256xf32>
    %c6_48 = arith.constant 6 : index
    %c0_49 = arith.constant 0 : index
    %123 = vector.load %arg8[%c6_48, %c0_49] : memref<16x256xf32, #tpu.memory_space<vmem>>, vector<2x256xf32>
    %c8 = arith.constant 8 : index
    %c0_50 = arith.constant 0 : index
    %124 = vector.load %arg8[%c8, %c0_50] : memref<16x256xf32, #tpu.memory_space<vmem>>, vector<2x256xf32>
    %125 = vector.shape_cast %32 : vector<1x256xi1> to vector<1x256xi1>
    %126 = vector.broadcast %125 : vector<1x256xi1> to vector<2x256xi1>
    %127 = arith.select %126, %123, %124 : vector<2x256xi1>, vector<2x256xf32>
    %128 = arith.addf %127, %122 : vector<2x256xf32>
    %129 = arith.negf %128 : vector<2x256xf32>
    %130 = math.exp %129 : vector<2x256xf32>
    %cst_51 = arith.constant 1.000000e+00 : f32
    %131 = vector.broadcast %cst_51 : f32 to vector<2x256xf32>
    %132 = arith.addf %131, %130 : vector<2x256xf32>
    %133 = arith.divf %131, %132 : vector<2x256xf32>
    %134 = vector.extract_strided_slice %133 {offsets = [0, 0], sizes = [2, 64], strides = [1, 1]} : vector<2x256xf32> to vector<2x64xf32>
    %135 = vector.extract_strided_slice %133 {offsets = [0, 64], sizes = [2, 64], strides = [1, 1]} : vector<2x256xf32> to vector<2x64xf32>
    %136 = vector.extract_strided_slice %133 {offsets = [0, 128], sizes = [2, 64], strides = [1, 1]} : vector<2x256xf32> to vector<2x64xf32>
    %137 = vector.extract_strided_slice %133 {offsets = [0, 192], sizes = [2, 64], strides = [1, 1]} : vector<2x256xf32> to vector<2x64xf32>
    %138 = arith.addf %135, %111 : vector<2x64xf32>
    %139 = arith.mulf %134, %136 : vector<2x64xf32>
    %140 = arith.addf %138, %139 : vector<2x64xf32>
    %141 = math.tanh %140 : vector<2x64xf32>
    %142 = arith.addf %137, %141 : vector<2x64xf32>
    %143 = vector.extract_strided_slice %142 {offsets = [0, 0], sizes = [2, 32], strides = [1, 1]} : vector<2x64xf32> to vector<2x32xf32>
    %c3 = arith.constant 3 : index
    %c0_52 = arith.constant 0 : index
    %c0_53 = arith.constant 0 : index
    %144 = vector.load %arg6[%c3, %c0_52, %c0_53] : memref<8x2x64xf32, #tpu.memory_space<vmem>>, vector<1x2x32xf32>
    %145 = vector.shape_cast %144 : vector<1x2x32xf32> to vector<2x32xf32>
    %146 = vector.shape_cast %143 : vector<2x32xf32> to vector<1x2x32xf32>
    tpu.vector_store %arg6[%c3, %c0_52, %c0_53], %146 {strides = array<i32>} : memref<8x2x64xf32, #tpu.memory_space<vmem>>, vector<1x2x32xf32>,
    %147 = vector.extract_strided_slice %142 {offsets = [0, 32], sizes = [2, 32], strides = [1, 1]} : vector<2x64xf32> to vector<2x32xf32>
    %c4_54 = arith.constant 4 : index
    %c0_55 = arith.constant 0 : index
    %c32_56 = arith.constant 32 : index
    %148 = vector.load %arg6[%c4_54, %c0_55, %c32_56] : memref<8x2x64xf32, #tpu.memory_space<vmem>>, vector<1x2x32xf32>
    %149 = vector.shape_cast %148 : vector<1x2x32xf32> to vector<2x32xf32>
    %150 = vector.shape_cast %147 : vector<2x32xf32> to vector<1x2x32xf32>
    tpu.vector_store %arg6[%c4_54, %c0_55, %c32_56], %150 {strides = array<i32>} : memref<8x2x64xf32, #tpu.memory_space<vmem>>, vector<1x2x32xf32>,
    %cst_57 = arith.constant dense<0.000000e+00> : vector<2x256xf32>
    %151 = tpu.matmul %142, %13, %cst_57 {dimension_numbers = #tpu.dot_dimension_numbers<[1], [0], [0], [1], [0, 0, 1, 1], [], []>} : vector<2x64xf32>, vector<64x256xf32>, vector<2x256xf32> -> vector<2x256xf32>
    %c8_58 = arith.constant 8 : index
    %c0_59 = arith.constant 0 : index
    %152 = vector.load %arg8[%c8_58, %c0_59] : memref<16x256xf32, #tpu.memory_space<vmem>>, vector<2x256xf32>
    %c6_60 = arith.constant 6 : index
    %c0_61 = arith.constant 0 : index
    %153 = vector.load %arg8[%c6_60, %c0_61] : memref<16x256xf32, #tpu.memory_space<vmem>>, vector<2x256xf32>
    %154 = vector.shape_cast %32 : vector<1x256xi1> to vector<1x256xi1>
    %155 = vector.broadcast %154 : vector<1x256xi1> to vector<2x256xi1>
    %156 = arith.select %155, %152, %153 : vector<2x256xi1>, vector<2x256xf32>
    %157 = arith.addf %156, %151 : vector<2x256xf32>
    %158 = arith.negf %157 : vector<2x256xf32>
    %159 = math.exp %158 : vector<2x256xf32>
    %cst_62 = arith.constant 1.000000e+00 : f32
    %160 = vector.broadcast %cst_62 : f32 to vector<2x256xf32>
    %161 = arith.addf %160, %159 : vector<2x256xf32>
    %162 = arith.divf %160, %161 : vector<2x256xf32>
    %163 = vector.extract_strided_slice %162 {offsets = [0, 0], sizes = [2, 64], strides = [1, 1]} : vector<2x256xf32> to vector<2x64xf32>
    %164 = vector.extract_strided_slice %162 {offsets = [0, 64], sizes = [2, 64], strides = [1, 1]} : vector<2x256xf32> to vector<2x64xf32>
    %165 = vector.extract_strided_slice %162 {offsets = [0, 128], sizes = [2, 64], strides = [1, 1]} : vector<2x256xf32> to vector<2x64xf32>
    %166 = vector.extract_strided_slice %162 {offsets = [0, 192], sizes = [2, 64], strides = [1, 1]} : vector<2x256xf32> to vector<2x64xf32>
    %167 = arith.addf %164, %140 : vector<2x64xf32>
    %168 = arith.mulf %163, %165 : vector<2x64xf32>
    %169 = arith.addf %167, %168 : vector<2x64xf32>
    %170 = math.tanh %169 : vector<2x64xf32>
    %171 = arith.addf %166, %170 : vector<2x64xf32>
    %172 = vector.extract_strided_slice %171 {offsets = [0, 0], sizes = [2, 32], strides = [1, 1]} : vector<2x64xf32> to vector<2x32xf32>
    %c4_63 = arith.constant 4 : index
    %c0_64 = arith.constant 0 : index
    %c0_65 = arith.constant 0 : index
    %173 = vector.load %arg6[%c4_63, %c0_64, %c0_65] : memref<8x2x64xf32, #tpu.memory_space<vmem>>, vector<1x2x32xf32>
    %174 = vector.shape_cast %173 : vector<1x2x32xf32> to vector<2x32xf32>
    %175 = vector.shape_cast %172 : vector<2x32xf32> to vector<1x2x32xf32>
    tpu.vector_store %arg6[%c4_63, %c0_64, %c0_65], %175 {strides = array<i32>} : memref<8x2x64xf32, #tpu.memory_space<vmem>>, vector<1x2x32xf32>,
    %176 = vector.extract_strided_slice %171 {offsets = [0, 32], sizes = [2, 32], strides = [1, 1]} : vector<2x64xf32> to vector<2x32xf32>
    %c3_66 = arith.constant 3 : index
    %c0_67 = arith.constant 0 : index
    %c32_68 = arith.constant 32 : index
    %177 = vector.load %arg6[%c3_66, %c0_67, %c32_68] : memref<8x2x64xf32, #tpu.memory_space<vmem>>, vector<1x2x32xf32>
    %178 = vector.shape_cast %177 : vector<1x2x32xf32> to vector<2x32xf32>
    %179 = vector.shape_cast %176 : vector<2x32xf32> to vector<1x2x32xf32>
    tpu.vector_store %arg6[%c3_66, %c0_67, %c32_68], %179 {strides = array<i32>} : memref<8x2x64xf32, #tpu.memory_space<vmem>>, vector<1x2x32xf32>,
    %cst_69 = arith.constant dense<0.000000e+00> : vector<2x256xf32>
    %180 = tpu.matmul %171, %13, %cst_69 {dimension_numbers = #tpu.dot_dimension_numbers<[1], [0], [0], [1], [0, 0, 1, 1], [], []>} : vector<2x64xf32>, vector<64x256xf32>, vector<2x256xf32> -> vector<2x256xf32>
    %c10_70 = arith.constant 10 : index
    %c0_71 = arith.constant 0 : index
    %181 = vector.load %arg8[%c10_70, %c0_71] : memref<16x256xf32, #tpu.memory_space<vmem>>, vector<2x256xf32>
    %c4_72 = arith.constant 4 : index
    %c0_73 = arith.constant 0 : index
    %182 = vector.load %arg8[%c4_72, %c0_73] : memref<16x256xf32, #tpu.memory_space<vmem>>, vector<2x256xf32>
    %183 = vector.shape_cast %32 : vector<1x256xi1> to vector<1x256xi1>
    %184 = vector.broadcast %183 : vector<1x256xi1> to vector<2x256xi1>
    %185 = arith.select %184, %181, %182 : vector<2x256xi1>, vector<2x256xf32>
    %186 = arith.addf %185, %180 : vector<2x256xf32>
    %187 = arith.negf %186 : vector<2x256xf32>
    %188 = math.exp %187 : vector<2x256xf32>
    %cst_74 = arith.constant 1.000000e+00 : f32
    %189 = vector.broadcast %cst_74 : f32 to vector<2x256xf32>
    %190 = arith.addf %189, %188 : vector<2x256xf32>
    %191 = arith.divf %189, %190 : vector<2x256xf32>
    %192 = vector.extract_strided_slice %191 {offsets = [0, 0], sizes = [2, 64], strides = [1, 1]} : vector<2x256xf32> to vector<2x64xf32>
    %193 = vector.extract_strided_slice %191 {offsets = [0, 64], sizes = [2, 64], strides = [1, 1]} : vector<2x256xf32> to vector<2x64xf32>
    %194 = vector.extract_strided_slice %191 {offsets = [0, 128], sizes = [2, 64], strides = [1, 1]} : vector<2x256xf32> to vector<2x64xf32>
    %195 = vector.extract_strided_slice %191 {offsets = [0, 192], sizes = [2, 64], strides = [1, 1]} : vector<2x256xf32> to vector<2x64xf32>
    %196 = arith.addf %193, %169 : vector<2x64xf32>
    %197 = arith.mulf %192, %194 : vector<2x64xf32>
    %198 = arith.addf %196, %197 : vector<2x64xf32>
    %199 = math.tanh %198 : vector<2x64xf32>
    %200 = arith.addf %195, %199 : vector<2x64xf32>
    %201 = vector.extract_strided_slice %200 {offsets = [0, 0], sizes = [2, 32], strides = [1, 1]} : vector<2x64xf32> to vector<2x32xf32>
    %c5_75 = arith.constant 5 : index
    %c0_76 = arith.constant 0 : index
    %c0_77 = arith.constant 0 : index
    %202 = vector.load %arg6[%c5_75, %c0_76, %c0_77] : memref<8x2x64xf32, #tpu.memory_space<vmem>>, vector<1x2x32xf32>
    %203 = vector.shape_cast %202 : vector<1x2x32xf32> to vector<2x32xf32>
    %204 = vector.shape_cast %201 : vector<2x32xf32> to vector<1x2x32xf32>
    tpu.vector_store %arg6[%c5_75, %c0_76, %c0_77], %204 {strides = array<i32>} : memref<8x2x64xf32, #tpu.memory_space<vmem>>, vector<1x2x32xf32>,
    %205 = vector.extract_strided_slice %200 {offsets = [0, 32], sizes = [2, 32], strides = [1, 1]} : vector<2x64xf32> to vector<2x32xf32>
    %c2_78 = arith.constant 2 : index
    %c0_79 = arith.constant 0 : index
    %c32_80 = arith.constant 32 : index
    %206 = vector.load %arg6[%c2_78, %c0_79, %c32_80] : memref<8x2x64xf32, #tpu.memory_space<vmem>>, vector<1x2x32xf32>
    %207 = vector.shape_cast %206 : vector<1x2x32xf32> to vector<2x32xf32>
    %208 = vector.shape_cast %205 : vector<2x32xf32> to vector<1x2x32xf32>
    tpu.vector_store %arg6[%c2_78, %c0_79, %c32_80], %208 {strides = array<i32>} : memref<8x2x64xf32, #tpu.memory_space<vmem>>, vector<1x2x32xf32>,
    %cst_81 = arith.constant dense<0.000000e+00> : vector<2x256xf32>
    %209 = tpu.matmul %200, %13, %cst_81 {dimension_numbers = #tpu.dot_dimension_numbers<[1], [0], [0], [1], [0, 0, 1, 1], [], []>} : vector<2x64xf32>, vector<64x256xf32>, vector<2x256xf32> -> vector<2x256xf32>
    %c12_82 = arith.constant 12 : index
    %c0_83 = arith.constant 0 : index
    %210 = vector.load %arg8[%c12_82, %c0_83] : memref<16x256xf32, #tpu.memory_space<vmem>>, vector<2x256xf32>
    %c2_84 = arith.constant 2 : index
    %c0_85 = arith.constant 0 : index
    %211 = vector.load %arg8[%c2_84, %c0_85] : memref<16x256xf32, #tpu.memory_space<vmem>>, vector<2x256xf32>
    %212 = vector.shape_cast %32 : vector<1x256xi1> to vector<1x256xi1>
    %213 = vector.broadcast %212 : vector<1x256xi1> to vector<2x256xi1>
    %214 = arith.select %213, %210, %211 : vector<2x256xi1>, vector<2x256xf32>
    %215 = arith.addf %214, %209 : vector<2x256xf32>
    %216 = arith.negf %215 : vector<2x256xf32>
    %217 = math.exp %216 : vector<2x256xf32>
    %cst_86 = arith.constant 1.000000e+00 : f32
    %218 = vector.broadcast %cst_86 : f32 to vector<2x256xf32>
    %219 = arith.addf %218, %217 : vector<2x256xf32>
    %220 = arith.divf %218, %219 : vector<2x256xf32>
    %221 = vector.extract_strided_slice %220 {offsets = [0, 0], sizes = [2, 64], strides = [1, 1]} : vector<2x256xf32> to vector<2x64xf32>
    %222 = vector.extract_strided_slice %220 {offsets = [0, 64], sizes = [2, 64], strides = [1, 1]} : vector<2x256xf32> to vector<2x64xf32>
    %223 = vector.extract_strided_slice %220 {offsets = [0, 128], sizes = [2, 64], strides = [1, 1]} : vector<2x256xf32> to vector<2x64xf32>
    %224 = vector.extract_strided_slice %220 {offsets = [0, 192], sizes = [2, 64], strides = [1, 1]} : vector<2x256xf32> to vector<2x64xf32>
    %225 = arith.addf %222, %198 : vector<2x64xf32>
    %226 = arith.mulf %221, %223 : vector<2x64xf32>
    %227 = arith.addf %225, %226 : vector<2x64xf32>
    %228 = math.tanh %227 : vector<2x64xf32>
    %229 = arith.addf %224, %228 : vector<2x64xf32>
    %230 = vector.extract_strided_slice %229 {offsets = [0, 0], sizes = [2, 32], strides = [1, 1]} : vector<2x64xf32> to vector<2x32xf32>
    %c6_87 = arith.constant 6 : index
    %c0_88 = arith.constant 0 : index
    %c0_89 = arith.constant 0 : index
    %231 = vector.load %arg6[%c6_87, %c0_88, %c0_89] : memref<8x2x64xf32, #tpu.memory_space<vmem>>, vector<1x2x32xf32>
    %232 = vector.shape_cast %231 : vector<1x2x32xf32> to vector<2x32xf32>
    %233 = vector.shape_cast %230 : vector<2x32xf32> to vector<1x2x32xf32>
    tpu.vector_store %arg6[%c6_87, %c0_88, %c0_89], %233 {strides = array<i32>} : memref<8x2x64xf32, #tpu.memory_space<vmem>>, vector<1x2x32xf32>,
    %234 = vector.extract_strided_slice %229 {offsets = [0, 32], sizes = [2, 32], strides = [1, 1]} : vector<2x64xf32> to vector<2x32xf32>
    %c1_90 = arith.constant 1 : index
    %c0_91 = arith.constant 0 : index
    %c32_92 = arith.constant 32 : index
    %235 = vector.load %arg6[%c1_90, %c0_91, %c32_92] : memref<8x2x64xf32, #tpu.memory_space<vmem>>, vector<1x2x32xf32>
    %236 = vector.shape_cast %235 : vector<1x2x32xf32> to vector<2x32xf32>
    %237 = vector.shape_cast %234 : vector<2x32xf32> to vector<1x2x32xf32>
    tpu.vector_store %arg6[%c1_90, %c0_91, %c32_92], %237 {strides = array<i32>} : memref<8x2x64xf32, #tpu.memory_space<vmem>>, vector<1x2x32xf32>,
    %cst_93 = arith.constant dense<0.000000e+00> : vector<2x256xf32>
    %238 = tpu.matmul %229, %13, %cst_93 {dimension_numbers = #tpu.dot_dimension_numbers<[1], [0], [0], [1], [0, 0, 1, 1], [], []>} : vector<2x64xf32>, vector<64x256xf32>, vector<2x256xf32> -> vector<2x256xf32>
    %c14_94 = arith.constant 14 : index
    %c0_95 = arith.constant 0 : index
    %239 = vector.load %arg8[%c14_94, %c0_95] : memref<16x256xf32, #tpu.memory_space<vmem>>, vector<2x256xf32>
    %c0_96 = arith.constant 0 : index
    %c0_97 = arith.constant 0 : index
    %240 = vector.load %arg8[%c0_96, %c0_97] : memref<16x256xf32, #tpu.memory_space<vmem>>, vector<2x256xf32>
    %241 = vector.shape_cast %32 : vector<1x256xi1> to vector<1x256xi1>
    %242 = vector.broadcast %241 : vector<1x256xi1> to vector<2x256xi1>
    %243 = arith.select %242, %239, %240 : vector<2x256xi1>, vector<2x256xf32>
    %244 = arith.addf %243, %238 : vector<2x256xf32>
    %245 = arith.negf %244 : vector<2x256xf32>
    %246 = math.exp %245 : vector<2x256xf32>
    %cst_98 = arith.constant 1.000000e+00 : f32
    %247 = vector.broadcast %cst_98 : f32 to vector<2x256xf32>
    %248 = arith.addf %247, %246 : vector<2x256xf32>
    %249 = arith.divf %247, %248 : vector<2x256xf32>
    %250 = vector.extract_strided_slice %249 {offsets = [0, 0], sizes = [2, 64], strides = [1, 1]} : vector<2x256xf32> to vector<2x64xf32>
    %251 = vector.extract_strided_slice %249 {offsets = [0, 64], sizes = [2, 64], strides = [1, 1]} : vector<2x256xf32> to vector<2x64xf32>
    %252 = vector.extract_strided_slice %249 {offsets = [0, 128], sizes = [2, 64], strides = [1, 1]} : vector<2x256xf32> to vector<2x64xf32>
    %253 = vector.extract_strided_slice %249 {offsets = [0, 192], sizes = [2, 64], strides = [1, 1]} : vector<2x256xf32> to vector<2x64xf32>
    %254 = arith.addf %251, %227 : vector<2x64xf32>
    %255 = arith.mulf %250, %252 : vector<2x64xf32>
    %256 = arith.addf %254, %255 : vector<2x64xf32>
    %257 = math.tanh %256 : vector<2x64xf32>
    %258 = arith.addf %253, %257 : vector<2x64xf32>
    %259 = vector.extract_strided_slice %258 {offsets = [0, 0], sizes = [2, 32], strides = [1, 1]} : vector<2x64xf32> to vector<2x32xf32>
    %c7_99 = arith.constant 7 : index
    %c0_100 = arith.constant 0 : index
    %c0_101 = arith.constant 0 : index
    %260 = vector.load %arg6[%c7_99, %c0_100, %c0_101] : memref<8x2x64xf32, #tpu.memory_space<vmem>>, vector<1x2x32xf32>
    %261 = vector.shape_cast %260 : vector<1x2x32xf32> to vector<2x32xf32>
    %262 = vector.shape_cast %259 : vector<2x32xf32> to vector<1x2x32xf32>
    tpu.vector_store %arg6[%c7_99, %c0_100, %c0_101], %262 {strides = array<i32>} : memref<8x2x64xf32, #tpu.memory_space<vmem>>, vector<1x2x32xf32>,
    %263 = vector.extract_strided_slice %258 {offsets = [0, 32], sizes = [2, 32], strides = [1, 1]} : vector<2x64xf32> to vector<2x32xf32>
    %c0_102 = arith.constant 0 : index
    %c0_103 = arith.constant 0 : index
    %c32_104 = arith.constant 32 : index
    %264 = vector.load %arg6[%c0_102, %c0_103, %c32_104] : memref<8x2x64xf32, #tpu.memory_space<vmem>>, vector<1x2x32xf32>
    %265 = vector.shape_cast %264 : vector<1x2x32xf32> to vector<2x32xf32>
    %266 = vector.shape_cast %263 : vector<2x32xf32> to vector<1x2x32xf32>
    tpu.vector_store %arg6[%c0_102, %c0_103, %c32_104], %266 {strides = array<i32>} : memref<8x2x64xf32, #tpu.memory_space<vmem>>, vector<1x2x32xf32>,
    %c0_105 = arith.constant 0 : index
    %c0_106 = arith.constant 0 : index
    %267 = vector.load %arg7[%c0_105, %c0_106] : memref<2x64xf32, #tpu.memory_space<vmem>>, vector<2x64xf32>
    tpu.vector_store %arg7[%c0_105, %c0_106], %258 {strides = array<i32>} : memref<2x64xf32, #tpu.memory_space<vmem>>, vector<2x64xf32>,
    return
  }
}

</mosaic_0001>

<bundles_post_ra>
// kernel: bvlstm_forward.1
= control target key start
LH: loop header
LB: loop body
LE: loop exit
PB: predicated region body
PF: predicated region fallthrough
CT: control target
= control target key end

     0   :  { %13 = vsyncpa [#allocation4], 0  ;;  %s2081_s0 = inlined_call_operand.vmem [shape: f32[8,2,16], index: 0, kind: input, shape index: {}]   ;;  %s2082_s1 = inlined_call_operand.vmem [shape: f32[8,2,64], index: 1, kind: input, shape index: {}]   ;;  %s2083_s2 = inlined_call_operand.vmem [shape: f32[16,256], index: 2, kind: input, shape index: {}]   ;;  %s2084_s3 = inlined_call_operand.hbm [shape: f32[64,256], index: 3, kind: input, shape index: {}]   ;;  %s2085_s4 = inlined_call_operand.hbm [shape: f32[64,256], index: 4, kind: input, shape index: {}]   ;;  %s2086_s5 = inlined_call_operand.vmem [shape: f32[1,256], index: 5, kind: input, shape index: {}]   ;;  %s2087_s6 = inlined_call_operand.vmem [shape: f32[8,2,64], index: 6, kind: output, shape index: {0}]   ;;  %s2088_s7 = inlined_call_operand.hbm [shape: f32[2,64], index: 7, kind: output, shape index: {1}]  }
   0x1   :  { %14 = vsyncpa [#allocation7], 0 }
   0x2   :  { %15 = vsyncpa [#allocation5], 0  ;;  %s1624_s24 = smov [#allocation3]  }
   0x3   :  { %s27_s25 = sshll.u32 %s1624_s24, 4  ;;  %s28_s25 = int_to_ptr.vmem [resolvable:$true] %s27_s25 }
   0x4   :  { %s1566_s26 = scalar_lea.vmem %s28_s25, 2048  ;;  %p1571_p1 = scmp.lt.s32.totalorder %s28_s25, %s28_s25 }
   0x5   :  { %p1567_p0 = scmp.ne.s32.totalorder %s28_s25, %s1566_s26  ;;  %p1572_p2 = scmp.lt.s32.totalorder %s1566_s26, %s1566_s26 }
   0x7   :  { %p1573_p3 = por %p1572_p2, %p1571_p1 }
   0x9   :  { %p1574_p4 = pnand %p1573_p3, %p1567_p0 }
   0xb   :  { %1577 = shalt.err (!%p1574_p4)
}
   0xc   :  { %s1625_s27 = smov 256   ;;  %s1626_s28 = smov 16  }
   0xd   :  { %33 = dma.hbm_to_vmem [thread:$0]  %s2084_s3, 2048, %s28_s25, [#allocation4], %s1625_s27, %s1625_s27, %s1626_s28  }
   0xe   :  { %s1627_s8 = smov [#allocation6]  }
   0xf   :  { %s39_s9 = sshll.u32 %s1627_s8, 4  ;;  %s40_s9 = int_to_ptr.vmem [resolvable:$true] %s39_s9 }
  0x10   :  { %s1586_s10 = scalar_lea.vmem %s40_s9, 2048  ;;  %p1591_p6 = scmp.lt.s32.totalorder %s40_s9, %s40_s9 }
  0x11   :  { %p1587_p5 = scmp.ne.s32.totalorder %s40_s9, %s1586_s10  ;;  %p1592_p7 = scmp.lt.s32.totalorder %s1586_s10, %s1586_s10 }
  0x13   :  { %p1593_p8 = por %p1592_p7, %p1591_p6 }
  0x15   :  { %p1594_p9 = pnand %p1593_p8, %p1587_p5 }
  0x17   :  { %1597 = shalt.err (!%p1594_p9)
}
  0x18   :  { %45 = dma.hbm_to_vmem [thread:$0]  %s2085_s4, 2048, %s40_s9, [#allocation7], %s1625_s27, %s1625_s27, %s1626_s28  }
  0x19   :  { %1618 = dma.done.wait [#allocation4], 2048  }
  0x1a   :  { %1619 = vsyncadd [#allocation4], 4294965248 }
  0x1b   :  { %1620 = dma.done.wait [#allocation7], 2048  }
  0x1c   :  { %1621 = vsyncadd [#allocation7], 4294965248  ;;  %v1628_v0 = vmov 0.0   ;;  %v1629_v1 = vmov 1983009808   ;;  %v103_v3 = vlaneseq  ;;  %v89_v4 = vld [vmem:[#allocation3 + $0x78] sm:$0xff] }
  0x1d   :  { %325 = vmatprep.mubr.f32.mxu1 %v1628_v0  ;;  %201 = vmatprep.mubr.f32.mxu0 %v1628_v0  ;;  %v101_v2 = vunpack.c.l.s4 %v1629_v1  ;;  %v88_v5 = vld [vmem:[#allocation3 + $0x70] sm:$0xff]  ;;  %v87_v6 = vld [vmem:[#allocation3 + $0x68] sm:$0xff]  ;;  %v86_v7 = vld [vmem:[#allocation3 + $0x60] sm:$0xff]  ;;  %vm256_vm0 = vcmask 130048   ;;  %vm132_vm1 = vcmask 523264   ;;  %vm520_vm4 = vcmask 254976  }
  0x1e   :  { %153 = vmatprep.subr.mxu0 %v89_v4  ;;  %v1681_v9 = vshrl.u32 %v103_v3, 7  ;;  %v85_v10 = vld [vmem:[#allocation3 + $0x58] sm:$0xff]  ;;  %v84_v11 = vld [vmem:[#allocation3 + $0x50] sm:$0xff]  ;;  %v83_v12 = vld [vmem:[#allocation3 + $0x48] sm:$0xff]  ;;  %vm523_vm5 = vcmask 517376   ;;  %vm647_vm6 = vcmask 257026  }
  0x1f   :  { %v102_v8 = vunpack.c.0.s8 %v101_v2  ;;  %154 = vmatpush1.msra.mxu0 %v88_v5  ;;  %v73_v13 = vld [vmem:[%s2083_s2 + $0x18] sm:$0xff]  ;;  %v82_v14 = vld [vmem:[#allocation3 + $0x40] sm:$0xff]  ;;  %v72_v16 = vld [vmem:[%s2083_s2 + $0x10] sm:$0xff]  ;;  %vm650_vm7 = vcmask 519426   ;;  %vm907_vm8 = vcmask 261126   ;;  %vm910_vm9 = vcmask 523526  }
  0x20   :  { %155 = vmatprep.subr.mxu0 %v87_v6  ;;  %v81_v15 = vld [vmem:[#allocation3 + $0x38] sm:$0xff]  ;;  %289 = vmatprep.subr.mxu1 %v73_v13  ;;  %v80_v17 = vld [vmem:[#allocation3 + $0x30] sm:$0xff]  ;;  %v71_v18 = vld [vmem:[%s2083_s2 + $0x8] sm:$0xff]  ;;  %vm777_vm10 = vcmask 259076   ;;  %vm780_vm11 = vcmask 521476   ;;  %s1631_s22 = smov [#allocation8]  }
  0x21   :  { %156 = vmatpush1.msra.mxu0 %v86_v7  ;;  %290 = vmatpush1.msra.mxu1 %v72_v16  ;;  %v70_v19 = vld [vmem:[%s2083_s2] sm:$0xff]  ;;  %v105_v20 = vsub.s32 %v102_v8, %v1681_v9  ;;  %v79_v21 = vld [vmem:[#allocation3 + $0x28] sm:$0xff]  ;;  %v77_v28 = vld [vmem:[#allocation3 + $0x18] sm:$0xff]  ;;  %s1417_s23 = sshll.u32 %s1631_s22, 4  ;;  %vm1407_vm12 = vcmask 523270   ;;  %s1418_s23 = int_to_ptr.vmem [resolvable:$true] %s1417_s23 }
  0x22   :  { %157 = vmatprep.subr.mxu0 %v85_v10  ;;  %291 = vmatprep.subr.mxu1 %v71_v18  ;;  %v54_v22 = vld [vmem:[%s2081_s0] sm:$0x3]  ;;  %v55_v23 = vld [vmem:[%s2081_s0 + $0x2] sm:$0x3]  ;;  %v56_v25 = vld [vmem:[%s2081_s0 + $0x4] sm:$0x3]  ;;  %p1603_p11 = scmp.lt.s32.totalorder %s1418_s23, %s1418_s23 }
  0x23   :  { %158 = vmatpush1.msra.mxu0 %v84_v11  ;;  %v78_v24 = vld [vmem:[#allocation3 + $0x20] sm:$0xff]  ;;  %292 = vmatpush1.msra.mxu1 %v70_v19  ;;  %v222_v27 = vcombine.low %v54_v22, %v55_v23  ;;  %v1720_v36 = vld [vmem:[#allocation6 + $0x78] sm:$0xff]  ;;  %v58_v37 = vld [vmem:[%s2081_s0 + $0x8] sm:$0x3]  ;;  %v342_v18 = vsub.s32 0, %v1681_v9  ;;  %s1598_s26 = scalar_lea.vmem %s1418_s23, 32 }
  0x24   :  { %159 = vmatprep.subr.mxu0 %v83_v12  ;;  %v57_v26 = vld [vmem:[%s2081_s0 + $0x6] sm:$0x3]  ;;  %v62_v30 = vld [vmem:[%s2082_s1] sm:$0x3]  ;;  %v63_v31 = vld [vmem:[%s2082_s1 + $0x2] sm:$0x3]  ;;  %422 = vmatprep.subr.mxu1 %v1720_v36  ;;  %p1599_p10 = scmp.ne.s32.totalorder %s1418_s23, %s1598_s26  ;;  %p1604_p12 = scmp.lt.s32.totalorder %s1598_s26, %s1598_s26 }
  0x25   :  { %160 = vmatpush1.msra.mxu0 %v82_v14  ;;  %v223_v29 = vcombine.low %v56_v25, %v57_v26  ;;  %v64_v32 = vld [vmem:[%s2082_s1 + $0x4] sm:$0x3]  ;;  %v230_v33 = vrot.slane %v222_v27, %v105_v20  ;;  %v65_v34 = vld [vmem:[%s2082_s1 + $0x6] sm:$0x3]  ;;  %v98_v35 = vcombine.low %v62_v30, %v63_v31  ;;  %v59_v40 = vld [vmem:[%s2081_s0 + $0xa] sm:$0x3] }
  0x26   :  { %161 = vmatprep.subr.mxu0 %v81_v15  ;;  %v99_v39 = vcombine.low %v64_v32, %v65_v34  ;;  %v60_v41 = vld [vmem:[%s2081_s0 + $0xc] sm:$0x3]  ;;  %v61_v42 = vld [vmem:[%s2081_s0 + $0xe] sm:$0x3]  ;;  %v76_v43 = vld [vmem:[#allocation3 + $0x10] sm:$0xff]  ;;  %v239_v46 = vcombine.low %v58_v37, %v59_v40  ;;  %p1605_p13 = por %p1604_p12, %p1603_p11 }
  0x27   :  { %162 = vmatpush1.msra.mxu0 %v80_v17  ;;  %v237_v38 = vrot.slane %v223_v29, %v105_v20  ;;  %v75_v44 = vld [vmem:[#allocation3 + $0x8] sm:$0xff]  ;;  %v106_v45 = vrot.slane %v98_v35, %v105_v20  ;;  %v240_v47 = vcombine.low %v60_v41, %v61_v42  ;;  %v74_v54 = vld [vmem:[#allocation3] sm:$0xff]  ;;  %v1747_v57 = vld [vmem:[#allocation6 + $0x70] sm:$0xff] }
  0x28   :  { %163 = vmatprep.subr.mxu0 %v79_v21  ;;  %v66_v48 = vld [vmem:[%s2082_s1 + $0x8] sm:$0x3]  ;;  %v113_v50 = vrot.slane %v99_v39, %v105_v20  ;;  %v67_v51 = vld [vmem:[%s2082_s1 + $0xa] sm:$0x3]  ;;  %v68_v52 = vld [vmem:[%s2082_s1 + $0xc] sm:$0x3]  ;;  %v247_v55 = vrot.slane %v239_v46, %v105_v20  ;;  %p1606_p0 = pnand %p1605_p13, %p1599_p10 }
  0x29   :  { %164 = vmatpush1.msra.mxu0 %v78_v24  ;;  %v238_v49 = vcombine.low %v230_v33, %v237_v38  ;;  %v69_v53 = vld [vmem:[%s2082_s1 + $0xe] sm:$0x3]  ;;  %v254_v56 = vrot.slane %v240_v47, %v105_v20  ;;  %v115_v58 = vcombine.low %v66_v48, %v67_v51  ;;  %v1754_v2 = vld [vmem:[#allocation6 + $0x60] sm:$0xff]  ;;  %v1758_v5 = vld [vmem:[#allocation6 + $0x58] sm:$0xff]  ;;  %v346_v21 = vsub.s32 1, %v1681_v9 }
  0x2a   :  { %165 = vmatprep.subr.mxu0 %v77_v28  ;;  %v116_v59 = vcombine.low %v68_v52, %v69_v53  ;;  %v114_v60 = vcombine.low %v106_v45, %v113_v50  ;;  %v1750_v61 = vld [vmem:[#allocation6 + $0x68] sm:$0xff]  ;;  %v1762_v6 = vld [vmem:[#allocation6 + $0x50] sm:$0xff]  ;;  %v1769_v8 = vld [vmem:[#allocation6 + $0x40] sm:$0xff]  ;;  %v375_v9 = vand.u32 127, %v103_v3 }
  0x2b   :  { %166 = vmatpush1.msra.mxu0 %v76_v43  ;;  %1431 = vmatmul.mubr.msk.f32.vlgmr.msra.gmra.mxu1 %vm256_vm0, %v238_v49  ;;  %v255_v62 = vcombine.low %v247_v55, %v254_v56  ;;  %v123_v63 = vrot.slane %v115_v58, %v105_v20  ;;  %v1765_v7 = vld [vmem:[#allocation6 + $0x48] sm:$0xff]  ;;  %v1774_v10 = vld [vmem:[#allocation6 + $0x38] sm:$0xff]  ;;  %v1777_v11 = vld [vmem:[#allocation6 + $0x30] sm:$0xff] }
  0x2c   :  { %167 = vmatprep.subr.mxu0 %v75_v44  ;;  %331 = vmatprep.mubr.f32.mxu1 %v1628_v0  ;;  %v130_v1 = vrot.slane %v116_v59, %v105_v20  ;;  %v1781_v12 = vld [vmem:[#allocation6 + $0x28] sm:$0xff]  ;;  %v1785_v13 = vld [vmem:[#allocation6 + $0x20] sm:$0xff]  ;;  %v1789_v14 = vld [vmem:[#allocation6 + $0x18] sm:$0xff]  ;;  %v376_v40 = vadd.s32 128, %v375_v9  ;;  %v381_v41 = vand.u32 63, %v375_v9 }
  0x2d   :  { %168 = vmatpush1.msra.mxu0 %v74_v54  ;;  %423 = vmatpush1.msra.mxu1 %v1747_v57  ;;  %v1793_v15 = vld [vmem:[#allocation6 + $0x10] sm:$0xff]  ;;  %v1797_v16 = vld [vmem:[#allocation6 + $0x8] sm:$0xff]  ;;  %v1801_v17 = vld [vmem:[#allocation6] sm:$0xff] }
  0x2e   :  { %1429 = vmatmul.mubr.msk.f32.vlgmr.msra.gmra.mxu0 %vm132_vm1, %v114_v60  ;;  %424 = vmatprep.subr.mxu1 %v1750_v61  ;;  %v131_v4 = vcombine.low %v123_v63, %v130_v1  ;;  %v338_v19 = vld [vmem:[%s2086_s5] sm:$0x3]  ;;  %v388_v43 = vand.u32 63, %v376_v40  ;;  %vm1842_vm2 = vcmp.lt.s32.totalorder %v381_v41, 32  ;;  %s1630_s5 = smov 64  }
  0x2f   :  { %1432 = vmatmul.mubr.msk.f32.gmra.mxu1 %vm256_vm0, %v255_v62  ;;  %207 = vmatprep.mubr.f32.mxu0 %v1628_v0  ;;  %v343_v22 = vrot.slane %v338_v19, %v342_v18  ;;  %v347_v26 = vrot.slane %v338_v19, %v346_v21 }
  0x30   :  { %425 = vmatpush1.msra.mxu1 %v1754_v2  ;;  %470 = vmatprep.mubr.f32.mxu1 %v1628_v0  ;;  %vm1848_vm3 = vcmp.lt.s32.totalorder %v388_v43, 32 }
  0x31   :  { %426 = vmatprep.subr.mxu1 %v1758_v5  ;;  %543 = vmatprep.subr.mxu0 %v1720_v36 }
  0x32   :  { %1430 = vmatmul.mubr.msk.f32.gmra.mxu0 %vm132_vm1, %v131_v4  ;;  %427 = vmatpush1.msra.mxu1 %v1762_v6 }
  0x33   :  { %428 = vmatprep.subr.mxu1 %v1765_v7  ;;  %544 = vmatpush1.msra.mxu0 %v1747_v57 }
  0x34   :  { %429 = vmatpush1.msra.mxu1 %v1769_v8  ;;  %545 = vmatprep.subr.mxu0 %v1750_v61 }
  0x35   :  { %430 = vmatprep.subr.mxu1 %v1774_v10  ;;  %546 = vmatpush1.msra.mxu0 %v1754_v2 }
  0x36   :  { %431 = vmatpush1.msra.mxu1 %v1777_v11  ;;  %547 = vmatprep.subr.mxu0 %v1758_v5 }
  0x37   :  { %432 = vmatprep.subr.mxu1 %v1781_v12  ;;  %548 = vmatpush1.msra.mxu0 %v1762_v6 }
  0x38   :  { %433 = vmatpush1.msra.mxu1 %v1785_v13  ;;  %549 = vmatprep.subr.mxu0 %v1765_v7 }
  0x39   :  { %434 = vmatprep.subr.mxu1 %v1789_v14  ;;  %550 = vmatpush1.msra.mxu0 %v1769_v8 }
  0x3a   :  { %435 = vmatpush1.msra.mxu1 %v1793_v15  ;;  %551 = vmatprep.subr.mxu0 %v1774_v10 }
  0x3b   :  { %436 = vmatprep.subr.mxu1 %v1797_v16  ;;  %552 = vmatpush1.msra.mxu0 %v1777_v11 }
  0x3c   :  { %437 = vmatpush1.msra.mxu1 %v1801_v17  ;;  %553 = vmatprep.subr.mxu0 %v1781_v12 }
  0x3d   :  { %471 = vmatmul.mubr.f32.vlgmr.msra.gmra.mxu1 %v1628_v0  ;;  %554 = vmatpush1.msra.mxu0 %v1785_v13 }
  0x3e   :  { %555 = vmatprep.subr.mxu0 %v1789_v14  ;;  %591 = vmatprep.mubr.f32.mxu0 %v1628_v0 }
  0x3f   :  { %556 = vmatpush1.msra.mxu0 %v1793_v15  ;;  %673 = vmatprep.subr.mxu1 %v1720_v36 }
  0x40   :  { %557 = vmatprep.subr.mxu0 %v1797_v16  ;;  %674 = vmatpush1.msra.mxu1 %v1747_v57 }
  0x41   :  { %558 = vmatpush1.msra.mxu0 %v1801_v17  ;;  %675 = vmatprep.subr.mxu1 %v1750_v61 }
  0x42   :  { %676 = vmatpush1.msra.mxu1 %v1754_v2  ;;  %721 = vmatprep.mubr.f32.mxu1 %v1628_v0 }
  0x43   :  { %677 = vmatprep.subr.mxu1 %v1758_v5  ;;  %803 = vmatprep.subr.mxu0 %v1720_v36 }
  0x44   :  { %678 = vmatpush1.msra.mxu1 %v1762_v6 }
  0x45   :  { %679 = vmatprep.subr.mxu1 %v1765_v7 }
  0x46   :  { %680 = vmatpush1.msra.mxu1 %v1769_v8 }
  0x47   :  { %681 = vmatprep.subr.mxu1 %v1774_v10 }
  0x48   :  { %682 = vmatpush1.msra.mxu1 %v1777_v11 }
  0x49   :  { %683 = vmatprep.subr.mxu1 %v1781_v12 }
  0x4a   :  { %684 = vmatpush1.msra.mxu1 %v1785_v13 }
  0x4b   :  { %685 = vmatprep.subr.mxu1 %v1789_v14 }
  0x4c   :  { %686 = vmatpush1.msra.mxu1 %v1793_v15 }
  0x4d   :  { %687 = vmatprep.subr.mxu1 %v1797_v16 }
  0x4e   :  { %688 = vmatpush1.msra.mxu1 %v1801_v17 }
  0x4f   :  { %933 = vmatprep.subr.mxu1 %v1720_v36 }
  0xeb   :  { %v327_v20 = vpop.f32.mrf.mxu1 }
  0xed   :  { %v329_v23 = vpop.f32.mrf.mxu1 }
  0xee   :  { %v203_v24 = vpop.f32.mrf.mxu0 }
  0xef   :  { %v328_v25 = vadd.f32 %v327_v20, %v203_v24  ;;  %v333_v28 = vpop.f32.mrf.mxu1 }
  0xf0   :  { %v205_v27 = vpop.f32.mrf.mxu0 }
  0xf1   :  { %v350_v29 = vadd.f32 %v343_v22, %v328_v25  ;;  %v330_v30 = vadd.f32 %v329_v23, %v205_v27  ;;  %v335_v34 = vpop.f32.mrf.mxu1 }
  0xf2   :  { %v209_v31 = vpop.f32.mrf.mxu0 }
  0xf3   :  { %354 = vst [vmem:[#allocation2 + $0x10] sm:$0xff] %v350_v29  ;;  %v351_v32 = vadd.f32 %v347_v26, %v330_v30  ;;  %v334_v33 = vadd.f32 %v333_v28, %v209_v31 }
  0xf4   :  { %v211_v35 = vpop.f32.mrf.mxu0 }
  0xf5   :  { %355 = vst [vmem:[#allocation2] sm:$0xff] %v351_v32  ;;  %v352_v37 = vadd.f32 %v343_v22, %v334_v33  ;;  %v336_v38 = vadd.f32 %v335_v34, %v211_v35 }
  0xf7   :  { %356 = vst [vmem:[#allocation2 + $0x18] sm:$0xff] %v352_v37  ;;  %v353_v39 = vadd.f32 %v347_v26, %v336_v38 }
  0xf9   :  { %357 = vst [vmem:[#allocation2 + $0x8] sm:$0xff] %v353_v39 }
  0xfa   :  { %v477_v47 = vld [vmem:[#allocation2 + $0x10] sm:$0x3]  ;;  %v598_v29 = vld [vmem:[#allocation2 + $0x10] sm:$0xc] }
  0xfc   :  { %v478_v52 = vld [vmem:[#allocation2] sm:$0x3]  ;;  %v599_v34 = vld [vmem:[#allocation2] sm:$0xc] }
  0xfd   :  { %v472_v44 = vpop.f32.mrf.mxu1 }
  0xfe   :  { %v479_v42 = vld [vmem:[#allocation2 + $0x18] sm:$0xc0]  ;;  %v600_v24 = vld [vmem:[#allocation2 + $0x18] sm:$0x30] }
  0xff   :  { %v487_v45 = vrot.slane %v479_v42, 6  ;;  %v474_v53 = vpop.f32.mrf.mxu1  ;;  %v604_v26 = vrot.slane %v600_v24, 2 }
 0x100   :  { %v480_v48 = vld [vmem:[#allocation2 + $0x8] sm:$0xc0]  ;;  %v601_v25 = vld [vmem:[#allocation2 + $0x8] sm:$0x30] }
 0x101   :  { %v491_v49 = vsel %vm1842_vm2, %v477_v47, %v487_v45  ;;  %v488_v50 = vrot.slane %v480_v48, 6  ;;  %v605_v28 = vrot.slane %v601_v25, 2  ;;  %v608_v31 = vsel %vm1842_vm2, %v598_v29, %v604_v26 }
 0x102   :  { %v493_v3 = vadd.f32 %v491_v49, %v472_v44 }
 0x103   :  { %v492_v54 = vsel %vm1848_vm3, %v478_v52, %v488_v50  ;;  %v609_v37 = vsel %vm1848_vm3, %v599_v34, %v605_v28 }
 0x104   :  { %v1433_v55 = vmul.f32 -1.442695, %v493_v3  ;;  %v494_v56 = vadd.f32 %v492_v54, %v474_v53 }
 0x106   :  { %1478 = vpow2.f32 %v1433_v55  ;;  %v1434_v58 = vmul.f32 -1.442695, %v494_v56  ;;  %v730_v56 = vld [vmem:[#allocation2 + $0x18] sm:$0xc] }
 0x108   :  { %1480 = vpow2.f32 %v1434_v58  ;;  %v731_v58 = vld [vmem:[#allocation2 + $0x8] sm:$0xc] }
 0x113   :  { %v1479_v59 = vpop.eup %1478 }
 0x114   :  { %v501_v60 = vadd.f32 1.0, %v1479_v59  ;;  %v734_v59 = vrot.slane %v730_v56, 6 }
 0x115   :  { %v1481_v62 = vpop.eup %1480 }
 0x116   :  { %v502_v63 = vadd.f32 1.0, %v1481_v62  ;;  %1482 = vrcp.f32 %v501_v60  ;;  %v735_v62 = vrot.slane %v731_v58, 6 }
 0x118   :  { %1484 = vrcp.f32 %v502_v63  ;;  %v728_v63 = vld [vmem:[#allocation2 + $0x10] sm:$0x30] }
 0x123   :  { %v1483_v1 = vpop.eup %1482 }
 0x125   :  { %v1485_v4 = vpop.eup %1484 }
 0x126   :  { %v508_v18 = vmul.f32 %v1485_v4, %v1483_v1 }
 0x128   :  { %510 = vrot.lane.b32.xlu0 %v508_v18, %s1630_s5 }
 0x19a   :  { %v511_v19 = vpop.permute.xlu0 %510 }
 0x19b   :  { %v513_v20 = vadd.f32 %v1483_v1, %v511_v19 }
 0x19d   :  { %1486 = vtanh.f32 %v513_v20  ;;  %v631_v44 = vrot.slane %v513_v20, 6  ;;  %v729_v20 = vld [vmem:[#allocation2] sm:$0x30] }
 0x1aa   :  { %v1487_v21 = vpop.eup %1486 }
 0x1ab   :  { %v515_v22 = vadd.f32 %v1487_v21, %v1485_v4  ;;  %v738_v4 = vsel %vm1842_vm2, %v728_v63, %v734_v59 }
 0x1ad   :  { %517 = vrot.lane.b32.xlu0 %v515_v22, %s1630_s5  ;;  %v739_v22 = vsel %vm1848_vm3, %v729_v20, %v735_v62 }
 0x21f   :  { %v518_v23 = vpop.permute.xlu0 %517 }
 0x220   :  { %521 = vst.msk [vmem:[%s2087_s6] sm:$0x3] %vm520_vm4, %v518_v23  ;;  %1436 = vmatmul.mubr.msk.f32.vlgmr.msra.gmra.mxu0 %vm132_vm1, %v518_v23 }
 0x221   :  { %1435 = vst.msk [vmem:[%s2087_s6 + $0xe] sm:$0x3] %vm523_vm5, %v518_v23  ;;  %804 = vmatpush1.msra.mxu0 %v1747_v57  ;;  %851 = vmatprep.mubr.f32.mxu0 %v1628_v0 }
 0x222   :  { %805 = vmatprep.subr.mxu0 %v1750_v61 }
 0x223   :  { %806 = vmatpush1.msra.mxu0 %v1754_v2 }
 0x224   :  { %807 = vmatprep.subr.mxu0 %v1758_v5 }
 0x225   :  { %808 = vmatpush1.msra.mxu0 %v1762_v6 }
 0x226   :  { %809 = vmatprep.subr.mxu0 %v1765_v7 }
 0x227   :  { %810 = vmatpush1.msra.mxu0 %v1769_v8 }
 0x228   :  { %811 = vmatprep.subr.mxu0 %v1774_v10 }
 0x229   :  { %812 = vmatpush1.msra.mxu0 %v1777_v11 }
 0x22a   :  { %813 = vmatprep.subr.mxu0 %v1781_v12 }
 0x22b   :  { %814 = vmatpush1.msra.mxu0 %v1785_v13 }
 0x22c   :  { %815 = vmatprep.subr.mxu0 %v1789_v14 }
 0x22d   :  { %816 = vmatpush1.msra.mxu0 %v1793_v15 }
 0x22e   :  { %817 = vmatprep.subr.mxu0 %v1797_v16 }
 0x22f   :  { %818 = vmatpush1.msra.mxu0 %v1801_v17 }
 0x230   :  { %1050 = vmatprep.subr.mxu0 %v1720_v36 }
 0x2e0   :  { %v593_v27 = vpop.f32.mrf.mxu0 }
 0x2e1   :  { %v612_v30 = vrot.slane %v593_v27, 6 }
 0x2e2   :  { %v595_v32 = vpop.f32.mrf.mxu0 }
 0x2e3   :  { %v616_v33 = vadd.f32 %v612_v30, %v608_v31  ;;  %v613_v35 = vrot.slane %v595_v32, 6 }
 0x2e5   :  { %v1437_v38 = vmul.f32 -1.442695, %v616_v33  ;;  %v617_v9 = vadd.f32 %v613_v35, %v609_v37 }
 0x2e7   :  { %1488 = vpow2.f32 %v1437_v38  ;;  %v1438_v39 = vmul.f32 -1.442695, %v617_v9 }
 0x2e9   :  { %1490 = vpow2.f32 %v1438_v39 }
 0x2f4   :  { %v1489_v40 = vpop.eup %1488 }
 0x2f5   :  { %v624_v41 = vadd.f32 1.0, %v1489_v40 }
 0x2f6   :  { %v1491_v42 = vpop.eup %1490 }
 0x2f7   :  { %1492 = vrcp.f32 %v624_v41  ;;  %v625_v43 = vadd.f32 1.0, %v1491_v42  ;;  %v860_v41 = vld [vmem:[#allocation2 + $0x18] sm:$0x3]  ;;  %v861_v42 = vld [vmem:[#allocation2 + $0x8] sm:$0x3] }
 0x2f9   :  { %1494 = vrcp.f32 %v625_v43  ;;  %v864_v43 = vrot.slane %v860_v41, 2 }
 0x304   :  { %v1493_v45 = vpop.eup %1492 }
 0x305   :  { %v633_v47 = vadd.f32 %v1493_v45, %v631_v44 }
 0x306   :  { %v1495_v48 = vpop.eup %1494 }
 0x307   :  { %v634_v49 = vmul.f32 %v1495_v48, %v1493_v45  ;;  %v865_v45 = vrot.slane %v861_v42, 2 }
 0x309   :  { %636 = vrot.lane.b32.xlu1 %v634_v49, %s1630_s5 }
 0x37b   :  { %v637_v50 = vpop.permute.xlu1 %636 }
 0x37c   :  { %v639_v3 = vadd.f32 %v637_v50, %v633_v47  ;;  %v858_v47 = vld [vmem:[#allocation2 + $0x10] sm:$0xc0] }
 0x37d   :  { %v868_v49 = vsel %vm1842_vm2, %v858_v47, %v864_v43 }
 0x37e   :  { %1496 = vtanh.f32 %v639_v3  ;;  %v761_v30 = vrot.slane %v639_v3, 6 }
 0x38b   :  { %v1497_v52 = vpop.eup %1496 }
 0x38c   :  { %v1887_v53 = vadd.f32 %v1497_v52, %v1495_v48  ;;  %v859_v52 = vld [vmem:[#allocation2] sm:$0xc0] }
 0x38e   :  { %v652_v54 = vrot.slane %v1887_v53, 2 }
 0x390   :  { %653 = vrot.lane.b32.xlu1 %v652_v54, %s1630_s5 }
 0x402   :  { %v654_v55 = vpop.permute.xlu1 %653 }
 0x403   :  { %1441 = vmatmul.mubr.msk.f32.vlgmr.msra.gmra.mxu1 %vm132_vm1, %v654_v55  ;;  %v869_v55 = vsel %vm1848_vm3, %v859_v52, %v865_v45 }
 0x404   :  { %934 = vmatpush1.msra.mxu1 %v1747_v57  ;;  %981 = vmatprep.mubr.f32.mxu1 %v1628_v0 }
 0x405   :  { %935 = vmatprep.subr.mxu1 %v1750_v61 }
 0x406   :  { %936 = vmatpush1.msra.mxu1 %v1754_v2 }
 0x407   :  { %937 = vmatprep.subr.mxu1 %v1758_v5 }
 0x408   :  { %938 = vmatpush1.msra.mxu1 %v1762_v6 }
 0x409   :  { %939 = vmatprep.subr.mxu1 %v1765_v7 }
 0x40a   :  { %940 = vmatpush1.msra.mxu1 %v1769_v8 }
 0x40b   :  { %941 = vmatprep.subr.mxu1 %v1774_v10 }
 0x40c   :  { %942 = vmatpush1.msra.mxu1 %v1777_v11 }
 0x40d   :  { %943 = vmatprep.subr.mxu1 %v1781_v12 }
 0x40e   :  { %944 = vmatpush1.msra.mxu1 %v1785_v13 }
 0x40f   :  { %945 = vmatprep.subr.mxu1 %v1789_v14 }
 0x410   :  { %946 = vmatpush1.msra.mxu1 %v1793_v15 }
 0x411   :  { %947 = vmatprep.subr.mxu1 %v1797_v16 }
 0x412   :  { %948 = vmatpush1.msra.mxu1 %v1801_v17 }
 0x413   :  { %1176 = vmatprep.subr.mxu1 %v1720_v36 }
 0x4c3   :  { %v723_v60 = vpop.f32.mrf.mxu1 }
 0x4c4   :  { %v742_v1 = vrot.slane %v723_v60, 4 }
 0x4c5   :  { %v725_v18 = vpop.f32.mrf.mxu1 }
 0x4c6   :  { %v746_v19 = vadd.f32 %v742_v1, %v738_v4  ;;  %v743_v21 = vrot.slane %v725_v18, 4 }
 0x4c8   :  { %v1442_v23 = vmul.f32 -1.442695, %v746_v19  ;;  %v747_v24 = vadd.f32 %v743_v21, %v739_v22 }
 0x4ca   :  { %1498 = vpow2.f32 %v1442_v23  ;;  %v1443_v25 = vmul.f32 -1.442695, %v747_v24 }
 0x4cc   :  { %1500 = vpow2.f32 %v1443_v25 }
 0x4d7   :  { %v1499_v26 = vpop.eup %1498 }
 0x4d8   :  { %v754_v27 = vadd.f32 1.0, %v1499_v26 }
 0x4d9   :  { %v1501_v28 = vpop.eup %1500 }
 0x4da   :  { %1502 = vrcp.f32 %v754_v27  ;;  %v755_v29 = vadd.f32 1.0, %v1501_v28  ;;  %v990_v27 = vld [vmem:[#allocation2 + $0x10] sm:$0xc0]  ;;  %v988_v28 = vld [vmem:[#allocation2 + $0x18] sm:$0x3] }
 0x4dc   :  { %1504 = vrcp.f32 %v755_v29  ;;  %v991_v29 = vld [vmem:[#allocation2] sm:$0xc0] }
 0x4e7   :  { %v1503_v31 = vpop.eup %1502 }
 0x4e8   :  { %v763_v32 = vadd.f32 %v1503_v31, %v761_v30  ;;  %v994_v30 = vrot.slane %v990_v27, 6  ;;  %v1233_v27 = vld [vmem:[#allocation2 + $0x10] sm:$0xc] }
 0x4e9   :  { %v1505_v33 = vpop.eup %1504 }
 0x4ea   :  { %v764_v34 = vmul.f32 %v1505_v33, %v1503_v31  ;;  %v989_v31 = vld [vmem:[#allocation2 + $0x8] sm:$0x3] }
 0x4ec   :  { %766 = vrot.lane.b32.xlu0 %v764_v34, %s1630_s5  ;;  %v995_v34 = vrot.slane %v991_v29, 6  ;;  %v1234_v29 = vld [vmem:[#allocation2] sm:$0xc] }
 0x55e   :  { %v767_v35 = vpop.permute.xlu0 %766 }
 0x55f   :  { %v769_v37 = vadd.f32 %v767_v35, %v763_v32 }
 0x561   :  { %1506 = vtanh.f32 %v769_v37  ;;  %v891_v1 = vrot.slane %v769_v37, 6 }
 0x56e   :  { %v1507_v38 = vpop.eup %1506 }
 0x56f   :  { %v1914_v9 = vadd.f32 %v1507_v38, %v1505_v33  ;;  %v998_v33 = vsel %vm1842_vm2, %v988_v28, %v994_v30  ;;  %v999_v38 = vsel %vm1848_vm3, %v989_v31, %v995_v34  ;;  %v1231_v28 = vld [vmem:[#allocation2 + $0x18] sm:$0x30]  ;;  %v1237_v31 = vrot.slane %v1233_v27, 6 }
 0x571   :  { %v782_v39 = vrot.slane %v1914_v9, 4  ;;  %v1241_v34 = vsel %vm1842_vm2, %v1231_v28, %v1237_v31 }
 0x573   :  { %783 = vrot.lane.b32.xlu1 %v782_v39, %s1630_s5 }
 0x5e5   :  { %v784_v40 = vpop.permute.xlu1 %783 }
 0x5e6   :  { %1446 = vmatmul.mubr.msk.f32.vlgmr.msra.gmra.mxu0 %vm132_vm1, %v784_v40 }
 0x5e7   :  { %1051 = vmatpush1.msra.mxu0 %v1747_v57  ;;  %1098 = vmatprep.mubr.f32.mxu0 %v1628_v0 }
 0x5e8   :  { %1052 = vmatprep.subr.mxu0 %v1750_v61 }
 0x5e9   :  { %1053 = vmatpush1.msra.mxu0 %v1754_v2 }
 0x5ea   :  { %1054 = vmatprep.subr.mxu0 %v1758_v5 }
 0x5eb   :  { %1055 = vmatpush1.msra.mxu0 %v1762_v6 }
 0x5ec   :  { %1056 = vmatprep.subr.mxu0 %v1765_v7 }
 0x5ed   :  { %1057 = vmatpush1.msra.mxu0 %v1769_v8 }
 0x5ee   :  { %1058 = vmatprep.subr.mxu0 %v1774_v10 }
 0x5ef   :  { %1059 = vmatpush1.msra.mxu0 %v1777_v11 }
 0x5f0   :  { %1060 = vmatprep.subr.mxu0 %v1781_v12 }
 0x5f1   :  { %1061 = vmatpush1.msra.mxu0 %v1785_v13 }
 0x5f2   :  { %1062 = vmatprep.subr.mxu0 %v1789_v14 }
 0x5f3   :  { %1063 = vmatpush1.msra.mxu0 %v1793_v15 }
 0x5f4   :  { %1064 = vmatprep.subr.mxu0 %v1797_v16 }
 0x5f5   :  { %1065 = vmatpush1.msra.mxu0 %v1801_v17 }
 0x5f6   :  { %1302 = vmatprep.subr.mxu0 %v1720_v36 }
 0x6a6   :  { %v853_v44 = vpop.f32.mrf.mxu0 }
 0x6a7   :  { %v872_v48 = vrot.slane %v853_v44, 2 }
 0x6a8   :  { %v855_v50 = vpop.f32.mrf.mxu0 }
 0x6a9   :  { %v876_v3 = vadd.f32 %v872_v48, %v868_v49  ;;  %v873_v54 = vrot.slane %v855_v50, 2 }
 0x6ab   :  { %v1447_v56 = vmul.f32 -1.442695, %v876_v3  ;;  %v877_v58 = vadd.f32 %v873_v54, %v869_v55 }
 0x6ad   :  { %1508 = vpow2.f32 %v1447_v56  ;;  %v1448_v36 = vmul.f32 -1.442695, %v877_v58 }
 0x6af   :  { %1510 = vpow2.f32 %v1448_v36 }
 0x6ba   :  { %v1509_v59 = vpop.eup %1508 }
 0x6bb   :  { %v884_v60 = vadd.f32 1.0, %v1509_v59 }
 0x6bc   :  { %v1511_v62 = vpop.eup %1510 }
 0x6bd   :  { %1512 = vrcp.f32 %v884_v60  ;;  %v885_v63 = vadd.f32 1.0, %v1511_v62 }
 0x6bf   :  { %1514 = vrcp.f32 %v885_v63 }
 0x6ca   :  { %v1513_v4 = vpop.eup %1512 }
 0x6cb   :  { %v893_v18 = vadd.f32 %v1513_v4, %v891_v1 }
 0x6cc   :  { %v1515_v19 = vpop.eup %1514 }
 0x6cd   :  { %v894_v20 = vmul.f32 %v1515_v19, %v1513_v4 }
 0x6cf   :  { %896 = vrot.lane.b32.xlu0 %v894_v20, %s1630_s5 }
 0x741   :  { %v897_v21 = vpop.permute.xlu0 %896 }
 0x742   :  { %v899_v22 = vadd.f32 %v897_v21, %v893_v18 }
 0x744   :  { %1516 = vtanh.f32 %v899_v22  ;;  %v1015_v47 = vrot.slane %v899_v22, 6 }
 0x751   :  { %v1517_v23 = vpop.eup %1516 }
 0x752   :  { %v1941_v24 = vadd.f32 %v1517_v23, %v1515_v19 }
 0x754   :  { %v912_v25 = vrot.slane %v1941_v24, 6 }
 0x756   :  { %913 = vrot.lane.b32.xlu1 %v912_v25, %s1630_s5 }
 0x7c8   :  { %v914_v26 = vpop.permute.xlu1 %913 }
 0x7c9   :  { %1451 = vmatmul.mubr.msk.f32.vlgmr.msra.gmra.mxu1 %vm132_vm1, %v914_v26 }
 0x7ca   :  { %1177 = vmatpush1.msra.mxu1 %v1747_v57  ;;  %1224 = vmatprep.mubr.f32.mxu1 %v1628_v0 }
 0x7cb   :  { %1178 = vmatprep.subr.mxu1 %v1750_v61 }
 0x7cc   :  { %1179 = vmatpush1.msra.mxu1 %v1754_v2 }
 0x7cd   :  { %1180 = vmatprep.subr.mxu1 %v1758_v5 }
 0x7ce   :  { %1181 = vmatpush1.msra.mxu1 %v1762_v6 }
 0x7cf   :  { %1182 = vmatprep.subr.mxu1 %v1765_v7 }
 0x7d0   :  { %1183 = vmatpush1.msra.mxu1 %v1769_v8 }
 0x7d1   :  { %1184 = vmatprep.subr.mxu1 %v1774_v10 }
 0x7d2   :  { %1185 = vmatpush1.msra.mxu1 %v1777_v11 }
 0x7d3   :  { %1186 = vmatprep.subr.mxu1 %v1781_v12 }
 0x7d4   :  { %1187 = vmatpush1.msra.mxu1 %v1785_v13 }
 0x7d5   :  { %1188 = vmatprep.subr.mxu1 %v1789_v14 }
 0x7d6   :  { %1189 = vmatpush1.msra.mxu1 %v1793_v15 }
 0x7d7   :  { %1190 = vmatprep.subr.mxu1 %v1797_v16 }
 0x7d8   :  { %1191 = vmatpush1.msra.mxu1 %v1801_v17 }
 0x889   :  { %v983_v32 = vpop.f32.mrf.mxu1 }
 0x88a   :  { %v1000_v35 = vadd.f32 %v998_v33, %v983_v32  ;;  %v1232_v33 = vld [vmem:[#allocation2 + $0x8] sm:$0x30] }
 0x88b   :  { %v985_v37 = vpop.f32.mrf.mxu1 }
 0x88c   :  { %v1452_v39 = vmul.f32 -1.442695, %v1000_v35  ;;  %v1001_v40 = vadd.f32 %v999_v38, %v985_v37  ;;  %v1238_v37 = vrot.slane %v1234_v29, 6 }
 0x88e   :  { %1518 = vpow2.f32 %v1452_v39  ;;  %v1453_v41 = vmul.f32 -1.442695, %v1001_v40  ;;  %v1242_v40 = vsel %vm1848_vm3, %v1232_v33, %v1238_v37 }
 0x890   :  { %1520 = vpow2.f32 %v1453_v41 }
 0x89b   :  { %v1519_v42 = vpop.eup %1518 }
 0x89c   :  { %v1008_v43 = vadd.f32 1.0, %v1519_v42 }
 0x89d   :  { %v1521_v44 = vpop.eup %1520 }
 0x89e   :  { %1522 = vrcp.f32 %v1008_v43  ;;  %v1009_v45 = vadd.f32 1.0, %v1521_v44 }
 0x8a0   :  { %1524 = vrcp.f32 %v1009_v45 }
 0x8ab   :  { %v1523_v48 = vpop.eup %1522 }
 0x8ac   :  { %v1017_v49 = vadd.f32 %v1523_v48, %v1015_v47 }
 0x8ad   :  { %v1525_v50 = vpop.eup %1524 }
 0x8ae   :  { %v1018_v3 = vmul.f32 %v1525_v50, %v1523_v48 }
 0x8b0   :  { %1020 = vrot.lane.b32.xlu0 %v1018_v3, %s1630_s5 }
 0x922   :  { %v1021_v52 = vpop.permute.xlu0 %1020 }
 0x923   :  { %v1023_v54 = vadd.f32 %v1021_v52, %v1017_v49 }
 0x925   :  { %1526 = vtanh.f32 %v1023_v54  ;;  %v1138_v63 = vrot.slane %v1023_v54, 6 }
 0x932   :  { %v1527_v55 = vpop.eup %1526 }
 0x933   :  { %v1025_v56 = vadd.f32 %v1527_v55, %v1525_v50 }
 0x935   :  { %1027 = vrot.lane.b32.xlu1 %v1025_v56, %s1630_s5 }
 0x9a7   :  { %v1968_v58 = vpop.permute.xlu1 %1027 }
 0x9a8   :  { %1456 = vmatmul.mubr.msk.f32.vlgmr.msra.gmra.mxu0 %vm132_vm1, %v1968_v58 }
 0x9a9   :  { %1303 = vmatpush1.msra.mxu0 %v1747_v57  ;;  %1350 = vmatprep.mubr.f32.mxu0 %v1628_v0  ;;  %v1107_v0 = vld [vmem:[#allocation2 + $0x10] sm:$0x30]  ;;  %v1105_v57 = vld [vmem:[#allocation2 + $0x18] sm:$0xc] }
 0x9aa   :  { %1304 = vmatprep.subr.mxu0 %v1750_v61  ;;  %v1108_v61 = vld [vmem:[#allocation2] sm:$0x30] }
 0x9ab   :  { %1305 = vmatpush1.msra.mxu0 %v1754_v2 }
 0x9ac   :  { %1306 = vmatprep.subr.mxu0 %v1758_v5  ;;  %v1111_v5 = vrot.slane %v1107_v0, 2 }
 0x9ad   :  { %1307 = vmatpush1.msra.mxu0 %v1762_v6 }
 0x9ae   :  { %1308 = vmatprep.subr.mxu0 %v1765_v7  ;;  %v1106_v7 = vld [vmem:[#allocation2 + $0x8] sm:$0xc] }
 0x9af   :  { %1309 = vmatpush1.msra.mxu0 %v1769_v8  ;;  %v1115_v8 = vsel %vm1842_vm2, %v1105_v57, %v1111_v5 }
 0x9b0   :  { %1310 = vmatprep.subr.mxu0 %v1774_v10 }
 0x9b1   :  { %1311 = vmatpush1.msra.mxu0 %v1777_v11  ;;  %v1112_v11 = vrot.slane %v1108_v61, 2 }
 0x9b2   :  { %1312 = vmatprep.subr.mxu0 %v1781_v12 }
 0x9b3   :  { %1313 = vmatpush1.msra.mxu0 %v1785_v13 }
 0x9b4   :  { %1314 = vmatprep.subr.mxu0 %v1789_v14  ;;  %v1116_v14 = vsel %vm1848_vm3, %v1106_v7, %v1112_v11  ;;  %v1360_v7 = vld [vmem:[#allocation2] sm:$0x3] }
 0x9b5   :  { %1315 = vmatpush1.msra.mxu0 %v1793_v15 }
 0x9b6   :  { %1316 = vmatprep.subr.mxu0 %v1797_v16 }
 0x9b7   :  { %1317 = vmatpush1.msra.mxu0 %v1801_v17 }
 0xa68   :  { %v1100_v2 = vpop.f32.mrf.mxu0 }
 0xa69   :  { %v1119_v6 = vrot.slane %v1100_v2, 6 }
 0xa6a   :  { %v1102_v10 = vpop.f32.mrf.mxu0 }
 0xa6b   :  { %v1123_v12 = vadd.f32 %v1119_v6, %v1115_v8  ;;  %v1120_v13 = vrot.slane %v1102_v10, 6  ;;  %v1357_v6 = vld [vmem:[#allocation2 + $0x18] sm:$0xc0] }
 0xa6d   :  { %v1457_v15 = vmul.f32 -1.442695, %v1123_v12  ;;  %v1124_v16 = vadd.f32 %v1120_v13, %v1116_v14  ;;  %v1358_v12 = vld [vmem:[#allocation2 + $0x8] sm:$0xc0] }
 0xa6f   :  { %1528 = vpow2.f32 %v1457_v15  ;;  %v1458_v17 = vmul.f32 -1.442695, %v1124_v16  ;;  %v1364_v15 = vrot.slane %v1360_v7, 2 }
 0xa71   :  { %1530 = vpow2.f32 %v1458_v17 }
 0xa7c   :  { %v1529_v36 = vpop.eup %1528 }
 0xa7d   :  { %v1131_v59 = vadd.f32 1.0, %v1529_v36  ;;  %v1368_v36 = vsel %vm1848_vm3, %v1358_v12, %v1364_v15 }
 0xa7e   :  { %v1531_v60 = vpop.eup %1530 }
 0xa7f   :  { %1532 = vrcp.f32 %v1131_v59  ;;  %v1132_v62 = vadd.f32 1.0, %v1531_v60 }
 0xa81   :  { %1534 = vrcp.f32 %v1132_v62 }
 0xa8c   :  { %v1533_v1 = vpop.eup %1532 }
 0xa8d   :  { %v1140_v4 = vadd.f32 %v1533_v1, %v1138_v63 }
 0xa8e   :  { %v1535_v18 = vpop.eup %1534 }
 0xa8f   :  { %v1141_v19 = vmul.f32 %v1535_v18, %v1533_v1 }
 0xa91   :  { %1143 = vrot.lane.b32.xlu0 %v1141_v19, %s1630_s5 }
 0xb03   :  { %v1144_v20 = vpop.permute.xlu0 %1143 }
 0xb04   :  { %v1146_v21 = vadd.f32 %v1144_v20, %v1140_v4 }
 0xb06   :  { %1536 = vtanh.f32 %v1146_v21  ;;  %v1264_v49 = vrot.slane %v1146_v21, 6 }
 0xb13   :  { %v1537_v22 = vpop.eup %1536 }
 0xb14   :  { %v1148_v23 = vadd.f32 %v1537_v22, %v1535_v18 }
 0xb16   :  { %v1155_v25 = vrot.slane %v1148_v23, 2 }
 0xb18   :  { %1156 = vrot.lane.b32.xlu1 %v1155_v25, %s1630_s5 }
 0xb8a   :  { %v1157_v26 = vpop.permute.xlu1 %1156 }
 0xb8b   :  { %1461 = vmatmul.mubr.msk.f32.vlgmr.msra.gmra.mxu1 %vm132_vm1, %v1157_v26 }
 0xc4b   :  { %v1226_v30 = vpop.f32.mrf.mxu1 }
 0xc4c   :  { %v1245_v32 = vrot.slane %v1226_v30, 4 }
 0xc4d   :  { %v1228_v35 = vpop.f32.mrf.mxu1 }
 0xc4e   :  { %v1249_v38 = vadd.f32 %v1245_v32, %v1241_v34  ;;  %v1246_v39 = vrot.slane %v1228_v35, 4 }
 0xc50   :  { %v1462_v41 = vmul.f32 -1.442695, %v1249_v38  ;;  %v1250_v42 = vadd.f32 %v1246_v39, %v1242_v40 }
 0xc52   :  { %1538 = vpow2.f32 %v1462_v41  ;;  %v1463_v43 = vmul.f32 -1.442695, %v1250_v42 }
 0xc54   :  { %1540 = vpow2.f32 %v1463_v43 }
 0xc5f   :  { %v1539_v44 = vpop.eup %1538 }
 0xc60   :  { %v1257_v45 = vadd.f32 1.0, %v1539_v44 }
 0xc61   :  { %v1541_v47 = vpop.eup %1540 }
 0xc62   :  { %1542 = vrcp.f32 %v1257_v45  ;;  %v1258_v48 = vadd.f32 1.0, %v1541_v47 }
 0xc64   :  { %1544 = vrcp.f32 %v1258_v48 }
 0xc6f   :  { %v1543_v50 = vpop.eup %1542 }
 0xc70   :  { %v1266_v3 = vadd.f32 %v1543_v50, %v1264_v49 }
 0xc71   :  { %v1545_v52 = vpop.eup %1544 }
 0xc72   :  { %v1267_v54 = vmul.f32 %v1545_v52, %v1543_v50 }
 0xc74   :  { %1269 = vrot.lane.b32.xlu0 %v1267_v54, %s1630_s5 }
 0xce6   :  { %v1270_v55 = vpop.permute.xlu0 %1269 }
 0xce7   :  { %v1272_v56 = vadd.f32 %v1270_v55, %v1266_v3 }
 0xce9   :  { %1546 = vtanh.f32 %v1272_v56  ;;  %v1390_v46 = vrot.slane %v1272_v56, 6 }
 0xcf6   :  { %v1547_v0 = vpop.eup %1546 }
 0xcf7   :  { %v2000_v57 = vadd.f32 %v1547_v0, %v1545_v52 }
 0xcf9   :  { %v1281_v61 = vrot.slane %v2000_v57, 4 }
 0xcfb   :  { %1282 = vrot.lane.b32.xlu1 %v1281_v61, %s1630_s5 }
 0xcff   :  { %643 = vrot.lane.b32.xlu1 %v1887_v53, %s1630_s5 }
 0xd03   :  { %903 = vrot.lane.b32.xlu1 %v1941_v24, %s1630_s5  ;;  %v1359_v24 = vld [vmem:[#allocation2 + $0x10] sm:$0x3] }
 0xd04   :  { %v1363_v10 = vrot.slane %v1359_v24, 2 }
 0xd06   :  { %v1367_v13 = vsel %vm1842_vm2, %v1357_v6, %v1363_v10 }
 0xd07   :  { %1150 = vrot.lane.b32.xlu1 %v1148_v23, %s1630_s5 }
 0xd6d   :  { %v1283_v2 = vpop.permute.xlu1 %1282 }
 0xd6e   :  { %1466 = vmatmul.mubr.msk.f32.vlgmr.msra.gmra.mxu0 %vm132_vm1, %v1283_v2 }
 0xd71   :  { %v644_v5 = vpop.permute.xlu1 %643 }
 0xd72   :  { %1439 = vst.msk [vmem:[%s2087_s6] sm:$0xc] %vm647_vm6, %v644_v5 }
 0xd73   :  { %1440 = vst.msk [vmem:[%s2087_s6 + $0xa] sm:$0xc] %vm650_vm7, %v644_v5 }
 0xd75   :  { %v904_v53 = vpop.permute.xlu1 %903 }
 0xd76   :  { %1449 = vst.msk [vmem:[%s2087_s6] sm:$0xc0] %vm907_vm8, %v904_v53 }
 0xd77   :  { %1450 = vst.msk [vmem:[%s2087_s6 + $0x2] sm:$0xc0] %vm910_vm9, %v904_v53 }
 0xd78   :  { %1454 = vst.msk [vmem:[%s2087_s6 + $0x8] sm:$0x3] %vm520_vm4, %v1968_v58 }
 0xd79   :  { %1455 = vst.msk [vmem:[%s2087_s6 + $0x6] sm:$0x3] %vm523_vm5, %v1968_v58  ;;  %v1151_v25 = vpop.permute.xlu1 %1150 }
 0xe2e   :  { %v1352_v8 = vpop.f32.mrf.mxu0 }
 0xe2f   :  { %v1371_v11 = vrot.slane %v1352_v8, 2 }
 0xe30   :  { %v1354_v14 = vpop.f32.mrf.mxu0 }
 0xe31   :  { %v1375_v16 = vadd.f32 %v1371_v11, %v1367_v13  ;;  %v1372_v17 = vrot.slane %v1354_v14, 2 }
 0xe33   :  { %v1467_v59 = vmul.f32 -1.442695, %v1375_v16  ;;  %v1376_v60 = vadd.f32 %v1372_v17, %v1368_v36 }
 0xe35   :  { %1548 = vpow2.f32 %v1467_v59  ;;  %v1468_v58 = vmul.f32 -1.442695, %v1376_v60 }
 0xe37   :  { %1550 = vpow2.f32 %v1468_v58 }
 0xe42   :  { %v1549_v62 = vpop.eup %1548 }
 0xe43   :  { %v1383_v63 = vadd.f32 1.0, %v1549_v62 }
 0xe44   :  { %v1551_v1 = vpop.eup %1550 }
 0xe45   :  { %1552 = vrcp.f32 %v1383_v63  ;;  %v1384_v4 = vadd.f32 1.0, %v1551_v1 }
 0xe47   :  { %1554 = vrcp.f32 %v1384_v4 }
 0xe52   :  { %v1553_v18 = vpop.eup %1552 }
 0xe53   :  { %v1392_v19 = vadd.f32 %v1553_v18, %v1390_v46 }
 0xe54   :  { %v1555_v20 = vpop.eup %1554 }
 0xe55   :  { %v1393_v21 = vmul.f32 %v1555_v20, %v1553_v18 }
 0xe57   :  { %1395 = vrot.lane.b32.xlu0 %v1393_v21, %s1630_s5 }
 0xe5b   :  { %773 = vrot.lane.b32.xlu0 %v1914_v9, %s1630_s5 }
 0xec9   :  { %v1396_v51 = vpop.permute.xlu0 %1395 }
 0xeca   :  { %v1398_v22 = vadd.f32 %v1396_v51, %v1392_v19 }
 0xecc   :  { %1556 = vtanh.f32 %v1398_v22 }
 0xecd   :  { %v774_v23 = vpop.permute.xlu0 %773 }
 0xece   :  { %1444 = vst.msk [vmem:[%s2087_s6] sm:$0x30] %vm777_vm10, %v774_v23 }
 0xecf   :  { %1445 = vst.msk [vmem:[%s2087_s6 + $0x6] sm:$0x30] %vm780_vm11, %v774_v23 }
 0xed0   :  { %1459 = vst.msk [vmem:[%s2087_s6 + $0x8] sm:$0xc] %vm647_vm6, %v1151_v25 }
 0xed1   :  { %1460 = vst.msk [vmem:[%s2087_s6 + $0x2] sm:$0xc] %vm650_vm7, %v1151_v25 }
 0xed9   :  { %v1557_v9 = vpop.eup %1556 }
 0xeda   :  { %v1400_v26 = vadd.f32 %v1557_v9, %v1555_v20 }
 0xedc   :  { %1402 = vrot.lane.b32.xlu0 %v1400_v26, %s1630_s5 }
 0xee0   :  { %1276 = vrot.lane.b32.xlu0 %v2000_v57, %s1630_s5 }
 0xf4e   :  { %v1403_v27 = vpop.permute.xlu0 %1402 }
 0xf4f   :  { %1469 = vst.msk [vmem:[%s2087_s6 + $0x8] sm:$0xc0] %vm907_vm8, %v1403_v27 }
 0xf50   :  { %1406 = vst.msk [vmem:[%s2087_s6 - $0x6] sm:$0xc0] %vm910_vm9, %v1403_v27 }
 0xf51   :  { %1408 = vst.msk [vmem:[#allocation8 - $0x6] sm:$0xc0] %vm1407_vm12, %v1403_v27 }
 0xf52   :  { %1609 = shalt.err (!%p1606_p0)
}
 0xf53   :  { %1420 = dma.vmem_to_hbm [thread:$0]  %s1418_s23, 32, %s2088_s7, [#allocation5]   ;;  %v1277_v28 = vpop.permute.xlu0 %1276 }
 0xf54   :  { %1464 = vst.msk [vmem:[%s2087_s6 + $0x8] sm:$0x30] %vm777_vm10, %v1277_v28 }
 0xf55   :  { %1465 = vst.msk [vmem:[%s2087_s6 - $0x2] sm:$0x30] %vm780_vm11, %v1277_v28 }
 0xf56   :  { %1622 = dma.done.wait [#allocation5], 32  }
 0xf57   :  { %1623 = vsyncadd [#allocation5], 4294967264 }
 0xf58   :  { %1426 = vsyncpa [#allocation4], 1 }
 0xf59   :  { %1427 = vsyncpa [#allocation7], 1 }
 0xf5a   :  { %1428 = vsyncpa [#allocation5], 1 }

</bundles_post_ra>
